<compile_context>
chip_gen: v7x
topology: tpu7x:2x2x1
jax: 0.10.0
libtpu: 0.0.40
codegen_flags: <defaults>
</compile_context>

<pallas_src>
import functools

import numpy as np
import jax
import jax.numpy as jnp
from jax import lax
from jax.experimental import pallas as pl
from jax.experimental.pallas import tpu as pltpu


def stats_kernel(p_ref, w_ref, stat_ref, y_ref, *, chunk):
    """Pass 1: accumulate per-lane sum / sum-of-squares of the conv output.

    p_ref    : (tm, 4*KP)   bf16  im2col rows (4 pool-window positions x KP taps)
    w_ref    : (4*KP, 4*C)  bf16  block-diagonal conv weight kron(I4, wk)
    stat_ref : (8, 4*C)     f32   resident accumulator; row 0 = sum, row 1 = sum of squares
    y_ref    : (tm, 4*C)    f32   VMEM scratch holding the matmul result
    """
    i = pl.program_id(0)

    @pl.when(i == 0)
    def _init():
        stat_ref[...] = jnp.zeros_like(stat_ref)

    # conv for this row tile: one MXU matmul (bf16 operands, f32 accumulation).
    y_ref[...] = jnp.dot(p_ref[...], w_ref[...], preferred_element_type=jnp.float32)

    tm = p_ref.shape[0]
    lanes = w_ref.shape[1]
    zero = jnp.zeros((1, lanes), jnp.float32)

    def body(k, carry):
        s1, s2 = carry
        r = pl.multiple_of(k * chunk, chunk)
        yk = y_ref[pl.ds(r, chunk), :]
        return (s1 + jnp.sum(yk, axis=0, keepdims=True),
                s2 + jnp.sum(yk * yk, axis=0, keepdims=True))

    s1, s2 = lax.fori_loop(0, tm // chunk, body, (zero, zero), unroll=True)
    stat_ref[0:1, :] += s1
    stat_ref[1:2, :] += s2


def apply_kernel(p_ref, w_ref, sc_ref, sh_ref, o_ref, y_ref, *, cout, chunk):
    """Pass 2: conv (recomputed) + BN + ReLU + 2x2 max-pool, streamed in sublane chunks.

    sc_ref / sh_ref : (1, 4*C) f32  BN scale / shift, tiled x4 across the position chunks.
    o_ref           : (tm//2, 2*C) f32  two pool windows packed per 128-lane row.
    y_ref           : (tm, 4*C) f32  VMEM scratch for the matmul result.
    """
    c = cout
    tm = p_ref.shape[0]
    half = tm // 2

    y_ref[...] = jnp.dot(p_ref[...], w_ref[...], preferred_element_type=jnp.float32)

    scale = sc_ref[...]                                    # (1, 4*C)
    shift = sh_ref[...]
    lane = lax.broadcasted_iota(jnp.int32, (chunk, 2 * c), 1)   # hoisted out of the loop

    def pool(z):
        # z: (chunk, 4*C) -> 4-way max over the position chunks via two lane rolls (XLU slot).
        m = jnp.maximum(z, pltpu.roll(z, 2 * c, axis=1))[:, :2 * c]
        return jnp.maximum(m, pltpu.roll(m, c, axis=1))    # (chunk, 2*C), replicated x2

    def body(k, carry):
        r = pl.multiple_of(k * chunk, chunk)
        zt = jnp.maximum(y_ref[pl.ds(r, chunk), :] * scale + shift, 0.0)         # tile top half
        zb = jnp.maximum(y_ref[pl.ds(r + half, chunk), :] * scale + shift, 0.0)  # tile bottom half
        # lanes [0,C): window r of the top half; lanes [C,2C): window r of the bottom half.
        o_ref[pl.ds(r, chunk), :] = jnp.where(lane < c, pool(zt), pool(zb))
        return carry

    lax.fori_loop(0, half // chunk, body, 0, unroll=True)


@jax.jit
def basic_block_forward(x_nchw, w_oihw, conv_b, gamma, beta):
    # NOTE: conv bias `conv_b` is intentionally unused — training-mode BN mean subtraction
    # cancels a per-channel constant exactly.  (In eval mode it would NOT cancel.)
    del conv_b
    n, cin, h, w = x_nchw.shape
    cout = w_oihw.shape[0]
    hh, wh = h // 2, w // 2
    kdep = 9 * cin                                  # im2col depth per position (27)
    kp = ((kdep + 31) // 32) * 32                   # padded to 32
    lanes = 4 * cout

    # ---- im2col (lane-dense): pack the 4 positions of each 2x2 pool window into one row.
    x_nhwc = jnp.transpose(x_nchw, (0, 2, 3, 1))
    xp = jnp.pad(x_nhwc, ((0, 0), (1, 1), (1, 1), (0, 0)))                 # pad=1 for 3x3 conv
    patches = jnp.concatenate(
        [xp[:, kh:kh + h, kw:kw + w, :] for kh in range(3) for kw in range(3)],
        axis=-1)                                                           # (N, H, W, 27)
    patches = jnp.pad(patches, ((0, 0), (0, 0), (0, 0), (0, kp - kdep)))
    p4 = (patches.reshape(n, hh, 2, wh, 2, kp)
                 .transpose(0, 1, 3, 2, 4, 5)                              # (n, hh, wh, dh, dw, kp)
                 .reshape(n * hh * wh, 4 * kp)).astype(jnp.bfloat16)       # (R, 128)

    rows = n * hh * wh
    tm_cap = 512                                     # sized for v7x VMEM; >=256 M for v6e/v7x MXU
    tm = min(tm_cap, ((rows + 31) // 32) * 32)       # tm % 32 == 0 so tm//2 is chunk-aligned
    rp = ((rows + tm - 1) // tm) * tm
    if rp != rows:
        p4 = jnp.pad(p4, ((0, rp - rows), (0, 0)))   # zero rows: contribute 0 to s1/s2, sliced off
    t = rp // tm
    chunk = 16

    # ---- block-diagonal conv weight: one matmul produces all 4 window positions.
    wk = jnp.transpose(w_oihw, (2, 3, 1, 0)).reshape(kdep, cout).astype(jnp.float32)   # (27, 64)
    wk = jnp.pad(wk, ((0, kp - kdep), (0, 0)))                                          # (32, 64)
    w4 = jnp.kron(jnp.eye(4, dtype=jnp.float32), wk).astype(jnp.bfloat16)               # (128, 256)

    # ---- pass 1: per-lane BN sums (row axis sequential -> stats stay batch-global).
    stat_raw = pl.pallas_call(
        functools.partial(stats_kernel, chunk=chunk),
        out_shape=jax.ShapeDtypeStruct((8, lanes), jnp.float32),
        grid=(t,),
        in_specs=[pl.BlockSpec((tm, 4 * kp), lambda i: (i, 0)),
                  pl.BlockSpec((4 * kp, lanes), lambda i: (0, 0))],
        out_specs=pl.BlockSpec((8, lanes), lambda i: (0, 0)),
        scratch_shapes=[pltpu.VMEM((tm, lanes), jnp.float32)],
        compiler_params=pltpu.CompilerParams(dimension_semantics=("arbitrary",)),
    )(p4, w4)

    # ---- tiny finalize in jnp: fold the 4 position chunks, build BN scale/shift (512 floats).
    inv_cnt = 1.0 / (4.0 * rows)                      # true sample count N*H*W (padding excluded)
    s1 = stat_raw[0].reshape(4, cout).sum(axis=0)
    s2 = stat_raw[1].reshape(4, cout).sum(axis=0)
    mean = s1 * inv_cnt
    # TODO(synk): E[y^2]-mean^2 can cancel for large per-channel means; clamp guards negativity.
    var = jnp.maximum(s2 * inv_cnt - mean * mean, 0.0)
    scale = gamma.astype(jnp.float32) * lax.rsqrt(var + 1e-5)
    shift = beta.astype(jnp.float32) - mean * scale
    sc4 = jnp.tile(scale, 4).reshape(1, lanes)
    sh4 = jnp.tile(shift, 4).reshape(1, lanes)

    # ---- pass 2: conv + BN + ReLU + pool (row axis parallel -> both v7x TensorCores).
    out_pk = pl.pallas_call(
        functools.partial(apply_kernel, cout=cout, chunk=chunk),
        out_shape=jax.ShapeDtypeStruct((rp // 2, 2 * cout), jnp.float32),
        grid=(t,),
        in_specs=[pl.BlockSpec((tm, 4 * kp), lambda i: (i, 0)),
                  pl.BlockSpec((4 * kp, lanes), lambda i: (0, 0)),
                  pl.BlockSpec((1, lanes), lambda i: (0, 0)),
                  pl.BlockSpec((1, lanes), lambda i: (0, 0))],
        out_specs=pl.BlockSpec((tm // 2, 2 * cout), lambda i: (i, 0)),
        scratch_shapes=[pltpu.VMEM((tm, lanes), jnp.float32)],
        compiler_params=pltpu.CompilerParams(dimension_semantics=("parallel",)),
    )(p4, w4, sc4, sh4)

    # ---- unpack the 2-windows-per-row layout and restore NCHW.
    out = (out_pk.reshape(t, tm // 2, 2, cout)
                 .transpose(0, 2, 1, 3)              # (tile, half, row, C) -> global window order
                 .reshape(rp, cout)[:rows]
                 .reshape(n, hh, wh, cout))
    return jnp.transpose(out, (0, 3, 1, 2))


def numpy_reference(x, w, b, gamma, beta, eps=1e-5):
    """Pure-numpy (float64) replica of the PyTorch forward in training mode (bias included)."""
    x = x.astype(np.float64); w = w.astype(np.float64)
    n, cin, h, w_ = x.shape
    cout = w.shape[0]
    xp = np.pad(x, ((0, 0), (0, 0), (1, 1), (1, 1)))
    y = np.zeros((n, cout, h, w_), np.float64)
    for kh in range(3):
        for kw in range(3):
            patch = xp[:, :, kh:kh + h, kw:kw + w_]
            y += np.einsum("nchw,oc->nohw", patch, w[:, :, kh, kw])
    y += b.reshape(1, cout, 1, 1)
    mean = y.mean(axis=(0, 2, 3), keepdims=True)
    var = y.var(axis=(0, 2, 3), keepdims=True)            # biased, as BN training-mode norm
    y = (y - mean) / np.sqrt(var + eps)
    y = y * gamma.reshape(1, cout, 1, 1) + beta.reshape(1, cout, 1, 1)
    y = np.maximum(y, 0.0)
    return y.reshape(n, cout, h // 2, 2, w_ // 2, 2).max(axis=(3, 5))


if __name__ == "__main__":
    key = jax.random.PRNGKey(0)
    kx, kw, kb, kg, kbe = jax.random.split(key, 5)

    N, CIN, H, W, COUT = 2, 3, 16, 16, 64
    x = jax.random.normal(kx, (N, CIN, H, W), jnp.float32)
    conv_w = jax.random.normal(kw, (COUT, CIN, 3, 3), jnp.float32) * 0.2
    conv_b = jax.random.normal(kb, (COUT,), jnp.float32) * 0.1
    bn_gamma = 1.0 + 0.3 * jax.random.normal(kg, (COUT,), jnp.float32)
    bn_beta = 0.1 * jax.random.normal(kbe, (COUT,), jnp.float32)

    out = jax.block_until_ready(basic_block_forward(x, conv_w, conv_b, bn_gamma, bn_beta))
    assert out.shape == (N, COUT, H // 2, W // 2), out.shape

    ref = numpy_reference(np.asarray(x), np.asarray(conv_w), np.asarray(conv_b),
                          np.asarray(bn_gamma), np.asarray(bn_beta))
    # bf16 MXU operands (f32 accumulation) -> slightly looser tolerance than a pure-f32 conv.
    np.testing.assert_allclose(np.asarray(out), ref, rtol=2e-2, atol=2e-2)

    print("KERNEL_OK")
</pallas_src>

<mosaic_0001>
module attributes {stable_mosaic.version = 11 : i64} {
  func.func @stats_kernel(%arg0: i32, %arg1: memref<128x128xbf16, #tpu.memory_space<vmem>>, %arg2: memref<128x256xbf16, #tpu.memory_space<vmem>>, %arg3: memref<8x256xf32, #tpu.memory_space<vmem>>, %arg4: memref<128x256xf32, #tpu.memory_space<vmem>>) attributes {dimension_semantics = [#tpu.dimension_semantics<arbitrary>], iteration_bounds = array<i64: 1>, scalar_prefetch = 0 : i64, scratch_operands = 1 : i64, tpu.core_type = #tpu.core_type<tc>, window_params = [{transform_indices = @transform_0, window_bounds = array<i64: 128, 128>}, {pipeline_mode = #tpu.pipeline_mode<synchronous>, transform_indices = @transform_1, window_bounds = array<i64: 128, 256>}, {pipeline_mode = #tpu.pipeline_mode<synchronous>, transform_indices = @transform_2, window_bounds = array<i64: 8, 256>}]} {
    %c0_i32 = arith.constant 0 : i32
    %0 = arith.cmpi eq, %arg0, %c0_i32 : i32
    %1 = arith.extui %0 : i1 to i32
    %c0_i32_0 = arith.constant 0 : i32
    %2 = arith.cmpi ne, %1, %c0_i32_0 : i32
    scf.if %2 {
      %cst_46 = arith.constant 0.000000e+00 : f32
      %102 = vector.broadcast %cst_46 : f32 to vector<8x256xf32>
      %c0_47 = arith.constant 0 : index
      %c0_48 = arith.constant 0 : index
      %103 = vector.load %arg3[%c0_47, %c0_48] : memref<8x256xf32, #tpu.memory_space<vmem>>, vector<8x256xf32>
      tpu.vector_store %arg3[%c0_47, %c0_48], %102 {strides = array<i32>} : memref<8x256xf32, #tpu.memory_space<vmem>>, vector<8x256xf32>,
    } else {
    }
    %c0 = arith.constant 0 : index
    %c0_1 = arith.constant 0 : index
    %3 = vector.load %arg1[%c0, %c0_1] : memref<128x128xbf16, #tpu.memory_space<vmem>>, vector<128x128xbf16>
    %c0_2 = arith.constant 0 : index
    %c0_3 = arith.constant 0 : index
    %4 = vector.load %arg2[%c0_2, %c0_3] : memref<128x256xbf16, #tpu.memory_space<vmem>>, vector<128x256xbf16>
    %cst = arith.constant dense<0.000000e+00> : vector<128x256xf32>
    %5 = tpu.matmul %3, %4, %cst {dimension_numbers = #tpu.dot_dimension_numbers<[1], [0], [0], [1], [0, 0, 1, 1], [], []>} : vector<128x128xbf16>, vector<128x256xbf16>, vector<128x256xf32> -> vector<128x256xf32>
    %c0_4 = arith.constant 0 : index
    %c0_5 = arith.constant 0 : index
    %6 = vector.load %arg4[%c0_4, %c0_5] : memref<128x256xf32, #tpu.memory_space<vmem>>, vector<128x256xf32>
    tpu.vector_store %arg4[%c0_4, %c0_5], %5 {strides = array<i32>} : memref<128x256xf32, #tpu.memory_space<vmem>>, vector<128x256xf32>,
    %cst_6 = arith.constant 0.000000e+00 : f32
    %7 = vector.broadcast %cst_6 : f32 to vector<1x256xf32>
    %c0_i32_7 = arith.constant 0 : i32
    %c16_i32 = arith.constant 16 : i32
    %8 = arith.muli %c0_i32_7, %c16_i32 : i32
    %9 = tpu.assume_multiple %8, 16 : i32
    %10 = arith.index_cast %9 : i32 to index
    %c0_8 = arith.constant 0 : index
    %11 = vector.load %arg4[%10, %c0_8] : memref<128x256xf32, #tpu.memory_space<vmem>>, vector<16x256xf32>
    %cst_9 = arith.constant dense<0.000000e+00> : vector<256xf32>
    %12 = vector.multi_reduction <add>, %11, %cst_9 [0] : vector<16x256xf32> to vector<256xf32>
    %13 = vector.shape_cast %12 : vector<256xf32> to vector<1x256xf32>
    %14 = arith.addf %7, %13 : vector<1x256xf32>
    %15 = arith.mulf %11, %11 : vector<16x256xf32>
    %cst_10 = arith.constant dense<0.000000e+00> : vector<256xf32>
    %16 = vector.multi_reduction <add>, %15, %cst_10 [0] : vector<16x256xf32> to vector<256xf32>
    %17 = vector.shape_cast %16 : vector<256xf32> to vector<1x256xf32>
    %18 = arith.addf %7, %17 : vector<1x256xf32>
    %c1_i32 = arith.constant 1 : i32
    %c16_i32_11 = arith.constant 16 : i32
    %19 = arith.muli %c1_i32, %c16_i32_11 : i32
    %20 = tpu.assume_multiple %19, 16 : i32
    %21 = arith.index_cast %20 : i32 to index
    %c0_12 = arith.constant 0 : index
    %22 = vector.load %arg4[%21, %c0_12] : memref<128x256xf32, #tpu.memory_space<vmem>>, vector<16x256xf32>
    %cst_13 = arith.constant dense<0.000000e+00> : vector<256xf32>
    %23 = vector.multi_reduction <add>, %22, %cst_13 [0] : vector<16x256xf32> to vector<256xf32>
    %24 = vector.shape_cast %23 : vector<256xf32> to vector<1x256xf32>
    %25 = arith.addf %14, %24 : vector<1x256xf32>
    %26 = arith.mulf %22, %22 : vector<16x256xf32>
    %cst_14 = arith.constant dense<0.000000e+00> : vector<256xf32>
    %27 = vector.multi_reduction <add>, %26, %cst_14 [0] : vector<16x256xf32> to vector<256xf32>
    %28 = vector.shape_cast %27 : vector<256xf32> to vector<1x256xf32>
    %29 = arith.addf %18, %28 : vector<1x256xf32>
    %c2_i32 = arith.constant 2 : i32
    %c16_i32_15 = arith.constant 16 : i32
    %30 = arith.muli %c2_i32, %c16_i32_15 : i32
    %31 = tpu.assume_multiple %30, 16 : i32
    %32 = arith.index_cast %31 : i32 to index
    %c0_16 = arith.constant 0 : index
    %33 = vector.load %arg4[%32, %c0_16] : memref<128x256xf32, #tpu.memory_space<vmem>>, vector<16x256xf32>
    %cst_17 = arith.constant dense<0.000000e+00> : vector<256xf32>
    %34 = vector.multi_reduction <add>, %33, %cst_17 [0] : vector<16x256xf32> to vector<256xf32>
    %35 = vector.shape_cast %34 : vector<256xf32> to vector<1x256xf32>
    %36 = arith.addf %25, %35 : vector<1x256xf32>
    %37 = arith.mulf %33, %33 : vector<16x256xf32>
    %cst_18 = arith.constant dense<0.000000e+00> : vector<256xf32>
    %38 = vector.multi_reduction <add>, %37, %cst_18 [0] : vector<16x256xf32> to vector<256xf32>
    %39 = vector.shape_cast %38 : vector<256xf32> to vector<1x256xf32>
    %40 = arith.addf %29, %39 : vector<1x256xf32>
    %c3_i32 = arith.constant 3 : i32
    %c16_i32_19 = arith.constant 16 : i32
    %41 = arith.muli %c3_i32, %c16_i32_19 : i32
    %42 = tpu.assume_multiple %41, 16 : i32
    %43 = arith.index_cast %42 : i32 to index
    %c0_20 = arith.constant 0 : index
    %44 = vector.load %arg4[%43, %c0_20] : memref<128x256xf32, #tpu.memory_space<vmem>>, vector<16x256xf32>
    %cst_21 = arith.constant dense<0.000000e+00> : vector<256xf32>
    %45 = vector.multi_reduction <add>, %44, %cst_21 [0] : vector<16x256xf32> to vector<256xf32>
    %46 = vector.shape_cast %45 : vector<256xf32> to vector<1x256xf32>
    %47 = arith.addf %36, %46 : vector<1x256xf32>
    %48 = arith.mulf %44, %44 : vector<16x256xf32>
    %cst_22 = arith.constant dense<0.000000e+00> : vector<256xf32>
    %49 = vector.multi_reduction <add>, %48, %cst_22 [0] : vector<16x256xf32> to vector<256xf32>
    %50 = vector.shape_cast %49 : vector<256xf32> to vector<1x256xf32>
    %51 = arith.addf %40, %50 : vector<1x256xf32>
    %c4_i32 = arith.constant 4 : i32
    %c16_i32_23 = arith.constant 16 : i32
    %52 = arith.muli %c4_i32, %c16_i32_23 : i32
    %53 = tpu.assume_multiple %52, 16 : i32
    %54 = arith.index_cast %53 : i32 to index
    %c0_24 = arith.constant 0 : index
    %55 = vector.load %arg4[%54, %c0_24] : memref<128x256xf32, #tpu.memory_space<vmem>>, vector<16x256xf32>
    %cst_25 = arith.constant dense<0.000000e+00> : vector<256xf32>
    %56 = vector.multi_reduction <add>, %55, %cst_25 [0] : vector<16x256xf32> to vector<256xf32>
    %57 = vector.shape_cast %56 : vector<256xf32> to vector<1x256xf32>
    %58 = arith.addf %47, %57 : vector<1x256xf32>
    %59 = arith.mulf %55, %55 : vector<16x256xf32>
    %cst_26 = arith.constant dense<0.000000e+00> : vector<256xf32>
    %60 = vector.multi_reduction <add>, %59, %cst_26 [0] : vector<16x256xf32> to vector<256xf32>
    %61 = vector.shape_cast %60 : vector<256xf32> to vector<1x256xf32>
    %62 = arith.addf %51, %61 : vector<1x256xf32>
    %c5_i32 = arith.constant 5 : i32
    %c16_i32_27 = arith.constant 16 : i32
    %63 = arith.muli %c5_i32, %c16_i32_27 : i32
    %64 = tpu.assume_multiple %63, 16 : i32
    %65 = arith.index_cast %64 : i32 to index
    %c0_28 = arith.constant 0 : index
    %66 = vector.load %arg4[%65, %c0_28] : memref<128x256xf32, #tpu.memory_space<vmem>>, vector<16x256xf32>
    %cst_29 = arith.constant dense<0.000000e+00> : vector<256xf32>
    %67 = vector.multi_reduction <add>, %66, %cst_29 [0] : vector<16x256xf32> to vector<256xf32>
    %68 = vector.shape_cast %67 : vector<256xf32> to vector<1x256xf32>
    %69 = arith.addf %58, %68 : vector<1x256xf32>
    %70 = arith.mulf %66, %66 : vector<16x256xf32>
    %cst_30 = arith.constant dense<0.000000e+00> : vector<256xf32>
    %71 = vector.multi_reduction <add>, %70, %cst_30 [0] : vector<16x256xf32> to vector<256xf32>
    %72 = vector.shape_cast %71 : vector<256xf32> to vector<1x256xf32>
    %73 = arith.addf %62, %72 : vector<1x256xf32>
    %c6_i32 = arith.constant 6 : i32
    %c16_i32_31 = arith.constant 16 : i32
    %74 = arith.muli %c6_i32, %c16_i32_31 : i32
    %75 = tpu.assume_multiple %74, 16 : i32
    %76 = arith.index_cast %75 : i32 to index
    %c0_32 = arith.constant 0 : index
    %77 = vector.load %arg4[%76, %c0_32] : memref<128x256xf32, #tpu.memory_space<vmem>>, vector<16x256xf32>
    %cst_33 = arith.constant dense<0.000000e+00> : vector<256xf32>
    %78 = vector.multi_reduction <add>, %77, %cst_33 [0] : vector<16x256xf32> to vector<256xf32>
    %79 = vector.shape_cast %78 : vector<256xf32> to vector<1x256xf32>
    %80 = arith.addf %69, %79 : vector<1x256xf32>
    %81 = arith.mulf %77, %77 : vector<16x256xf32>
    %cst_34 = arith.constant dense<0.000000e+00> : vector<256xf32>
    %82 = vector.multi_reduction <add>, %81, %cst_34 [0] : vector<16x256xf32> to vector<256xf32>
    %83 = vector.shape_cast %82 : vector<256xf32> to vector<1x256xf32>
    %84 = arith.addf %73, %83 : vector<1x256xf32>
    %c7_i32 = arith.constant 7 : i32
    %c16_i32_35 = arith.constant 16 : i32
    %85 = arith.muli %c7_i32, %c16_i32_35 : i32
    %86 = tpu.assume_multiple %85, 16 : i32
    %87 = arith.index_cast %86 : i32 to index
    %c0_36 = arith.constant 0 : index
    %88 = vector.load %arg4[%87, %c0_36] : memref<128x256xf32, #tpu.memory_space<vmem>>, vector<16x256xf32>
    %cst_37 = arith.constant dense<0.000000e+00> : vector<256xf32>
    %89 = vector.multi_reduction <add>, %88, %cst_37 [0] : vector<16x256xf32> to vector<256xf32>
    %90 = vector.shape_cast %89 : vector<256xf32> to vector<1x256xf32>
    %91 = arith.addf %80, %90 : vector<1x256xf32>
    %92 = arith.mulf %88, %88 : vector<16x256xf32>
    %cst_38 = arith.constant dense<0.000000e+00> : vector<256xf32>
    %93 = vector.multi_reduction <add>, %92, %cst_38 [0] : vector<16x256xf32> to vector<256xf32>
    %94 = vector.shape_cast %93 : vector<256xf32> to vector<1x256xf32>
    %95 = arith.addf %84, %94 : vector<1x256xf32>
    %c8_i32 = arith.constant 8 : i32
    %c0_39 = arith.constant 0 : index
    %c0_40 = arith.constant 0 : index
    %96 = vector.load %arg3[%c0_39, %c0_40] : memref<8x256xf32, #tpu.memory_space<vmem>>, vector<1x256xf32>
    %97 = arith.addf %96, %91 : vector<1x256xf32>
    %c0_41 = arith.constant 0 : index
    %c0_42 = arith.constant 0 : index
    %98 = vector.load %arg3[%c0_41, %c0_42] : memref<8x256xf32, #tpu.memory_space<vmem>>, vector<1x256xf32>
    tpu.vector_store %arg3[%c0_41, %c0_42], %97 {strides = array<i32>} : memref<8x256xf32, #tpu.memory_space<vmem>>, vector<1x256xf32>,
    %c1 = arith.constant 1 : index
    %c0_43 = arith.constant 0 : index
    %99 = vector.load %arg3[%c1, %c0_43] : memref<8x256xf32, #tpu.memory_space<vmem>>, vector<1x256xf32>
    %100 = arith.addf %99, %95 : vector<1x256xf32>
    %c1_44 = arith.constant 1 : index
    %c0_45 = arith.constant 0 : index
    %101 = vector.load %arg3[%c1_44, %c0_45] : memref<8x256xf32, #tpu.memory_space<vmem>>, vector<1x256xf32>
    tpu.vector_store %arg3[%c1_44, %c0_45], %100 {strides = array<i32>} : memref<8x256xf32, #tpu.memory_space<vmem>>, vector<1x256xf32>,
    return
  }
  func.func @transform_0(%arg0: i32) -> (i32, i32) {
    %c0_i32 = arith.constant 0 : i32
    %c0_i32_0 = arith.constant 0 : i32
    return %arg0, %c0_i32 : i32, i32
  }
  func.func @transform_1(%arg0: i32) -> (i32, i32) {
    %c0_i32 = arith.constant 0 : i32
    %c0_i32_0 = arith.constant 0 : i32
    %c0_i32_1 = arith.constant 0 : i32
    return %c0_i32, %c0_i32_0 : i32, i32
  }
  func.func @transform_2(%arg0: i32) -> (i32, i32) {
    %c0_i32 = arith.constant 0 : i32
    %c0_i32_0 = arith.constant 0 : i32
    %c0_i32_1 = arith.constant 0 : i32
    return %c0_i32, %c0_i32_0 : i32, i32
  }
}

module attributes {stable_mosaic.version = 11 : i64} {
  func.func @apply_kernel(%arg0: i32, %arg1: memref<128x128xbf16, #tpu.memory_space<vmem>>, %arg2: memref<128x256xbf16, #tpu.memory_space<vmem>>, %arg3: memref<1x256xf32, #tpu.memory_space<vmem>>, %arg4: memref<1x256xf32, #tpu.memory_space<vmem>>, %arg5: memref<64x128xf32, #tpu.memory_space<vmem>>, %arg6: memref<128x256xf32, #tpu.memory_space<vmem>>) attributes {dimension_semantics = [#tpu.dimension_semantics<parallel>], iteration_bounds = array<i64: 1>, scalar_prefetch = 0 : i64, scratch_operands = 1 : i64, tpu.core_type = #tpu.core_type<tc>, window_params = [{transform_indices = @transform_0, window_bounds = array<i64: 128, 128>}, {pipeline_mode = #tpu.pipeline_mode<synchronous>, transform_indices = @transform_1, window_bounds = array<i64: 128, 256>}, {pipeline_mode = #tpu.pipeline_mode<synchronous>, transform_indices = @transform_2, window_bounds = array<i64: 1, 256>}, {pipeline_mode = #tpu.pipeline_mode<synchronous>, transform_indices = @transform_3, window_bounds = array<i64: 1, 256>}, {transform_indices = @transform_4, window_bounds = array<i64: 64, 128>}]} {
    %c0 = arith.constant 0 : index
    %c0_0 = arith.constant 0 : index
    %0 = vector.load %arg1[%c0, %c0_0] : memref<128x128xbf16, #tpu.memory_space<vmem>>, vector<128x128xbf16>
    %c0_1 = arith.constant 0 : index
    %c0_2 = arith.constant 0 : index
    %1 = vector.load %arg2[%c0_1, %c0_2] : memref<128x256xbf16, #tpu.memory_space<vmem>>, vector<128x256xbf16>
    %cst = arith.constant dense<0.000000e+00> : vector<128x256xf32>
    %2 = tpu.matmul %0, %1, %cst {dimension_numbers = #tpu.dot_dimension_numbers<[1], [0], [0], [1], [0, 0, 1, 1], [], []>} : vector<128x128xbf16>, vector<128x256xbf16>, vector<128x256xf32> -> vector<128x256xf32>
    %c0_3 = arith.constant 0 : index
    %c0_4 = arith.constant 0 : index
    %3 = vector.load %arg6[%c0_3, %c0_4] : memref<128x256xf32, #tpu.memory_space<vmem>>, vector<128x256xf32>
    tpu.vector_store %arg6[%c0_3, %c0_4], %2 {strides = array<i32>} : memref<128x256xf32, #tpu.memory_space<vmem>>, vector<128x256xf32>,
    %c0_5 = arith.constant 0 : index
    %c0_6 = arith.constant 0 : index
    %4 = vector.load %arg3[%c0_5, %c0_6] : memref<1x256xf32, #tpu.memory_space<vmem>>, vector<1x256xf32>
    %c0_7 = arith.constant 0 : index
    %c0_8 = arith.constant 0 : index
    %5 = vector.load %arg4[%c0_7, %c0_8] : memref<1x256xf32, #tpu.memory_space<vmem>>, vector<1x256xf32>
    %6 = tpu.iota {dimensions = array<i32: 1>} : vector<16x128xi32>
    %c0_i32 = arith.constant 0 : i32
    %c16_i32 = arith.constant 16 : i32
    %7 = arith.muli %c0_i32, %c16_i32 : i32
    %8 = tpu.assume_multiple %7, 16 : i32
    %9 = arith.index_cast %8 : i32 to index
    %c0_9 = arith.constant 0 : index
    %10 = vector.load %arg6[%9, %c0_9] : memref<128x256xf32, #tpu.memory_space<vmem>>, vector<16x256xf32>
    %11 = vector.broadcast %4 : vector<1x256xf32> to vector<16x256xf32>
    %12 = arith.mulf %10, %11 : vector<16x256xf32>
    %13 = vector.broadcast %5 : vector<1x256xf32> to vector<16x256xf32>
    %14 = arith.addf %12, %13 : vector<16x256xf32>
    %cst_10 = arith.constant 0.000000e+00 : f32
    %15 = vector.broadcast %cst_10 : f32 to vector<16x256xf32>
    %16 = arith.maximumf %14, %15 : vector<16x256xf32>
    %c64_i32 = arith.constant 64 : i32
    %17 = arith.addi %8, %c64_i32 : i32
    %18 = arith.index_cast %17 : i32 to index
    %c0_11 = arith.constant 0 : index
    %19 = vector.load %arg6[%18, %c0_11] : memref<128x256xf32, #tpu.memory_space<vmem>>, vector<16x256xf32>
    %20 = vector.broadcast %4 : vector<1x256xf32> to vector<16x256xf32>
    %21 = arith.mulf %19, %20 : vector<16x256xf32>
    %22 = vector.broadcast %5 : vector<1x256xf32> to vector<16x256xf32>
    %23 = arith.addf %21, %22 : vector<16x256xf32>
    %cst_12 = arith.constant 0.000000e+00 : f32
    %24 = vector.broadcast %cst_12 : f32 to vector<16x256xf32>
    %25 = arith.maximumf %23, %24 : vector<16x256xf32>
    %c64_i32_13 = arith.constant 64 : i32
    %26 = vector.broadcast %c64_i32_13 : i32 to vector<16x128xi32>
    %27 = arith.cmpi slt, %6, %26 : vector<16x128xi32>
    %c128_i32 = arith.constant 128 : i32
    %28 = tpu.dynamic_rotate %16 by %c128_i32 dim 1 : vector<16x256xf32>, i32 -> vector<16x256xf32>
    %29 = arith.maximumf %16, %28 : vector<16x256xf32>
    %30 = vector.extract_strided_slice %29 {offsets = [0, 0], sizes = [16, 128], strides = [1, 1]} : vector<16x256xf32> to vector<16x128xf32>
    %c64_i32_14 = arith.constant 64 : i32
    %31 = tpu.dynamic_rotate %30 by %c64_i32_14 dim 1 : vector<16x128xf32>, i32 -> vector<16x128xf32>
    %32 = arith.maximumf %30, %31 : vector<16x128xf32>
    %c128_i32_15 = arith.constant 128 : i32
    %33 = tpu.dynamic_rotate %25 by %c128_i32_15 dim 1 : vector<16x256xf32>, i32 -> vector<16x256xf32>
    %34 = arith.maximumf %25, %33 : vector<16x256xf32>
    %35 = vector.extract_strided_slice %34 {offsets = [0, 0], sizes = [16, 128], strides = [1, 1]} : vector<16x256xf32> to vector<16x128xf32>
    %c64_i32_16 = arith.constant 64 : i32
    %36 = tpu.dynamic_rotate %35 by %c64_i32_16 dim 1 : vector<16x128xf32>, i32 -> vector<16x128xf32>
    %37 = arith.maximumf %35, %36 : vector<16x128xf32>
    %38 = arith.select %27, %32, %37 : vector<16x128xi1>, vector<16x128xf32>
    %39 = arith.index_cast %8 : i32 to index
    %c0_17 = arith.constant 0 : index
    %40 = vector.load %arg5[%39, %c0_17] : memref<64x128xf32, #tpu.memory_space<vmem>>, vector<16x128xf32>
    tpu.vector_store %arg5[%39, %c0_17], %38 {strides = array<i32>} : memref<64x128xf32, #tpu.memory_space<vmem>>, vector<16x128xf32>,
    %c1_i32 = arith.constant 1 : i32
    %c16_i32_18 = arith.constant 16 : i32
    %41 = arith.muli %c1_i32, %c16_i32_18 : i32
    %42 = tpu.assume_multiple %41, 16 : i32
    %43 = arith.index_cast %42 : i32 to index
    %c0_19 = arith.constant 0 : index
    %44 = vector.load %arg6[%43, %c0_19] : memref<128x256xf32, #tpu.memory_space<vmem>>, vector<16x256xf32>
    %45 = vector.broadcast %4 : vector<1x256xf32> to vector<16x256xf32>
    %46 = arith.mulf %44, %45 : vector<16x256xf32>
    %47 = vector.broadcast %5 : vector<1x256xf32> to vector<16x256xf32>
    %48 = arith.addf %46, %47 : vector<16x256xf32>
    %cst_20 = arith.constant 0.000000e+00 : f32
    %49 = vector.broadcast %cst_20 : f32 to vector<16x256xf32>
    %50 = arith.maximumf %48, %49 : vector<16x256xf32>
    %c64_i32_21 = arith.constant 64 : i32
    %51 = arith.addi %42, %c64_i32_21 : i32
    %52 = arith.index_cast %51 : i32 to index
    %c0_22 = arith.constant 0 : index
    %53 = vector.load %arg6[%52, %c0_22] : memref<128x256xf32, #tpu.memory_space<vmem>>, vector<16x256xf32>
    %54 = vector.broadcast %4 : vector<1x256xf32> to vector<16x256xf32>
    %55 = arith.mulf %53, %54 : vector<16x256xf32>
    %56 = vector.broadcast %5 : vector<1x256xf32> to vector<16x256xf32>
    %57 = arith.addf %55, %56 : vector<16x256xf32>
    %cst_23 = arith.constant 0.000000e+00 : f32
    %58 = vector.broadcast %cst_23 : f32 to vector<16x256xf32>
    %59 = arith.maximumf %57, %58 : vector<16x256xf32>
    %c64_i32_24 = arith.constant 64 : i32
    %60 = vector.broadcast %c64_i32_24 : i32 to vector<16x128xi32>
    %61 = arith.cmpi slt, %6, %60 : vector<16x128xi32>
    %c128_i32_25 = arith.constant 128 : i32
    %62 = tpu.dynamic_rotate %50 by %c128_i32_25 dim 1 : vector<16x256xf32>, i32 -> vector<16x256xf32>
    %63 = arith.maximumf %50, %62 : vector<16x256xf32>
    %64 = vector.extract_strided_slice %63 {offsets = [0, 0], sizes = [16, 128], strides = [1, 1]} : vector<16x256xf32> to vector<16x128xf32>
    %c64_i32_26 = arith.constant 64 : i32
    %65 = tpu.dynamic_rotate %64 by %c64_i32_26 dim 1 : vector<16x128xf32>, i32 -> vector<16x128xf32>
    %66 = arith.maximumf %64, %65 : vector<16x128xf32>
    %c128_i32_27 = arith.constant 128 : i32
    %67 = tpu.dynamic_rotate %59 by %c128_i32_27 dim 1 : vector<16x256xf32>, i32 -> vector<16x256xf32>
    %68 = arith.maximumf %59, %67 : vector<16x256xf32>
    %69 = vector.extract_strided_slice %68 {offsets = [0, 0], sizes = [16, 128], strides = [1, 1]} : vector<16x256xf32> to vector<16x128xf32>
    %c64_i32_28 = arith.constant 64 : i32
    %70 = tpu.dynamic_rotate %69 by %c64_i32_28 dim 1 : vector<16x128xf32>, i32 -> vector<16x128xf32>
    %71 = arith.maximumf %69, %70 : vector<16x128xf32>
    %72 = arith.select %61, %66, %71 : vector<16x128xi1>, vector<16x128xf32>
    %73 = arith.index_cast %42 : i32 to index
    %c0_29 = arith.constant 0 : index
    %74 = vector.load %arg5[%73, %c0_29] : memref<64x128xf32, #tpu.memory_space<vmem>>, vector<16x128xf32>
    tpu.vector_store %arg5[%73, %c0_29], %72 {strides = array<i32>} : memref<64x128xf32, #tpu.memory_space<vmem>>, vector<16x128xf32>,
    %c2_i32 = arith.constant 2 : i32
    %c16_i32_30 = arith.constant 16 : i32
    %75 = arith.muli %c2_i32, %c16_i32_30 : i32
    %76 = tpu.assume_multiple %75, 16 : i32
    %77 = arith.index_cast %76 : i32 to index
    %c0_31 = arith.constant 0 : index
    %78 = vector.load %arg6[%77, %c0_31] : memref<128x256xf32, #tpu.memory_space<vmem>>, vector<16x256xf32>
    %79 = vector.broadcast %4 : vector<1x256xf32> to vector<16x256xf32>
    %80 = arith.mulf %78, %79 : vector<16x256xf32>
    %81 = vector.broadcast %5 : vector<1x256xf32> to vector<16x256xf32>
    %82 = arith.addf %80, %81 : vector<16x256xf32>
    %cst_32 = arith.constant 0.000000e+00 : f32
    %83 = vector.broadcast %cst_32 : f32 to vector<16x256xf32>
    %84 = arith.maximumf %82, %83 : vector<16x256xf32>
    %c64_i32_33 = arith.constant 64 : i32
    %85 = arith.addi %76, %c64_i32_33 : i32
    %86 = arith.index_cast %85 : i32 to index
    %c0_34 = arith.constant 0 : index
    %87 = vector.load %arg6[%86, %c0_34] : memref<128x256xf32, #tpu.memory_space<vmem>>, vector<16x256xf32>
    %88 = vector.broadcast %4 : vector<1x256xf32> to vector<16x256xf32>
    %89 = arith.mulf %87, %88 : vector<16x256xf32>
    %90 = vector.broadcast %5 : vector<1x256xf32> to vector<16x256xf32>
    %91 = arith.addf %89, %90 : vector<16x256xf32>
    %cst_35 = arith.constant 0.000000e+00 : f32
    %92 = vector.broadcast %cst_35 : f32 to vector<16x256xf32>
    %93 = arith.maximumf %91, %92 : vector<16x256xf32>
    %c64_i32_36 = arith.constant 64 : i32
    %94 = vector.broadcast %c64_i32_36 : i32 to vector<16x128xi32>
    %95 = arith.cmpi slt, %6, %94 : vector<16x128xi32>
    %c128_i32_37 = arith.constant 128 : i32
    %96 = tpu.dynamic_rotate %84 by %c128_i32_37 dim 1 : vector<16x256xf32>, i32 -> vector<16x256xf32>
    %97 = arith.maximumf %84, %96 : vector<16x256xf32>
    %98 = vector.extract_strided_slice %97 {offsets = [0, 0], sizes = [16, 128], strides = [1, 1]} : vector<16x256xf32> to vector<16x128xf32>
    %c64_i32_38 = arith.constant 64 : i32
    %99 = tpu.dynamic_rotate %98 by %c64_i32_38 dim 1 : vector<16x128xf32>, i32 -> vector<16x128xf32>
    %100 = arith.maximumf %98, %99 : vector<16x128xf32>
    %c128_i32_39 = arith.constant 128 : i32
    %101 = tpu.dynamic_rotate %93 by %c128_i32_39 dim 1 : vector<16x256xf32>, i32 -> vector<16x256xf32>
    %102 = arith.maximumf %93, %101 : vector<16x256xf32>
    %103 = vector.extract_strided_slice %102 {offsets = [0, 0], sizes = [16, 128], strides = [1, 1]} : vector<16x256xf32> to vector<16x128xf32>
    %c64_i32_40 = arith.constant 64 : i32
    %104 = tpu.dynamic_rotate %103 by %c64_i32_40 dim 1 : vector<16x128xf32>, i32 -> vector<16x128xf32>
    %105 = arith.maximumf %103, %104 : vector<16x128xf32>
    %106 = arith.select %95, %100, %105 : vector<16x128xi1>, vector<16x128xf32>
    %107 = arith.index_cast %76 : i32 to index
    %c0_41 = arith.constant 0 : index
    %108 = vector.load %arg5[%107, %c0_41] : memref<64x128xf32, #tpu.memory_space<vmem>>, vector<16x128xf32>
    tpu.vector_store %arg5[%107, %c0_41], %106 {strides = array<i32>} : memref<64x128xf32, #tpu.memory_space<vmem>>, vector<16x128xf32>,
    %c3_i32 = arith.constant 3 : i32
    %c16_i32_42 = arith.constant 16 : i32
    %109 = arith.muli %c3_i32, %c16_i32_42 : i32
    %110 = tpu.assume_multiple %109, 16 : i32
    %111 = arith.index_cast %110 : i32 to index
    %c0_43 = arith.constant 0 : index
    %112 = vector.load %arg6[%111, %c0_43] : memref<128x256xf32, #tpu.memory_space<vmem>>, vector<16x256xf32>
    %113 = vector.broadcast %4 : vector<1x256xf32> to vector<16x256xf32>
    %114 = arith.mulf %112, %113 : vector<16x256xf32>
    %115 = vector.broadcast %5 : vector<1x256xf32> to vector<16x256xf32>
    %116 = arith.addf %114, %115 : vector<16x256xf32>
    %cst_44 = arith.constant 0.000000e+00 : f32
    %117 = vector.broadcast %cst_44 : f32 to vector<16x256xf32>
    %118 = arith.maximumf %116, %117 : vector<16x256xf32>
    %c64_i32_45 = arith.constant 64 : i32
    %119 = arith.addi %110, %c64_i32_45 : i32
    %120 = arith.index_cast %119 : i32 to index
    %c0_46 = arith.constant 0 : index
    %121 = vector.load %arg6[%120, %c0_46] : memref<128x256xf32, #tpu.memory_space<vmem>>, vector<16x256xf32>
    %122 = vector.broadcast %4 : vector<1x256xf32> to vector<16x256xf32>
    %123 = arith.mulf %121, %122 : vector<16x256xf32>
    %124 = vector.broadcast %5 : vector<1x256xf32> to vector<16x256xf32>
    %125 = arith.addf %123, %124 : vector<16x256xf32>
    %cst_47 = arith.constant 0.000000e+00 : f32
    %126 = vector.broadcast %cst_47 : f32 to vector<16x256xf32>
    %127 = arith.maximumf %125, %126 : vector<16x256xf32>
    %c64_i32_48 = arith.constant 64 : i32
    %128 = vector.broadcast %c64_i32_48 : i32 to vector<16x128xi32>
    %129 = arith.cmpi slt, %6, %128 : vector<16x128xi32>
    %c128_i32_49 = arith.constant 128 : i32
    %130 = tpu.dynamic_rotate %118 by %c128_i32_49 dim 1 : vector<16x256xf32>, i32 -> vector<16x256xf32>
    %131 = arith.maximumf %118, %130 : vector<16x256xf32>
    %132 = vector.extract_strided_slice %131 {offsets = [0, 0], sizes = [16, 128], strides = [1, 1]} : vector<16x256xf32> to vector<16x128xf32>
    %c64_i32_50 = arith.constant 64 : i32
    %133 = tpu.dynamic_rotate %132 by %c64_i32_50 dim 1 : vector<16x128xf32>, i32 -> vector<16x128xf32>
    %134 = arith.maximumf %132, %133 : vector<16x128xf32>
    %c128_i32_51 = arith.constant 128 : i32
    %135 = tpu.dynamic_rotate %127 by %c128_i32_51 dim 1 : vector<16x256xf32>, i32 -> vector<16x256xf32>
    %136 = arith.maximumf %127, %135 : vector<16x256xf32>
    %137 = vector.extract_strided_slice %136 {offsets = [0, 0], sizes = [16, 128], strides = [1, 1]} : vector<16x256xf32> to vector<16x128xf32>
    %c64_i32_52 = arith.constant 64 : i32
    %138 = tpu.dynamic_rotate %137 by %c64_i32_52 dim 1 : vector<16x128xf32>, i32 -> vector<16x128xf32>
    %139 = arith.maximumf %137, %138 : vector<16x128xf32>
    %140 = arith.select %129, %134, %139 : vector<16x128xi1>, vector<16x128xf32>
    %141 = arith.index_cast %110 : i32 to index
    %c0_53 = arith.constant 0 : index
    %142 = vector.load %arg5[%141, %c0_53] : memref<64x128xf32, #tpu.memory_space<vmem>>, vector<16x128xf32>
    tpu.vector_store %arg5[%141, %c0_53], %140 {strides = array<i32>} : memref<64x128xf32, #tpu.memory_space<vmem>>, vector<16x128xf32>,
    %c4_i32 = arith.constant 4 : i32
    return
  }
  func.func @transform_0(%arg0: i32) -> (i32, i32) {
    %c0_i32 = arith.constant 0 : i32
    %c0_i32_0 = arith.constant 0 : i32
    return %arg0, %c0_i32 : i32, i32
  }
  func.func @transform_1(%arg0: i32) -> (i32, i32) {
    %c0_i32 = arith.constant 0 : i32
    %c0_i32_0 = arith.constant 0 : i32
    %c0_i32_1 = arith.constant 0 : i32
    return %c0_i32, %c0_i32_0 : i32, i32
  }
  func.func @transform_2(%arg0: i32) -> (i32, i32) {
    %c0_i32 = arith.constant 0 : i32
    %c0_i32_0 = arith.constant 0 : i32
    %c0_i32_1 = arith.constant 0 : i32
    return %c0_i32, %c0_i32_0 : i32, i32
  }
  func.func @transform_3(%arg0: i32) -> (i32, i32) {
    %c0_i32 = arith.constant 0 : i32
    %c0_i32_0 = arith.constant 0 : i32
    %c0_i32_1 = arith.constant 0 : i32
    return %c0_i32, %c0_i32_0 : i32, i32
  }
  func.func @transform_4(%arg0: i32) -> (i32, i32) {
    %c0_i32 = arith.constant 0 : i32
    %c0_i32_0 = arith.constant 0 : i32
    return %arg0, %c0_i32 : i32, i32
  }
}

</mosaic_0001>

<bundles_post_ra>
// kernel: squeeze.2
= control target key start
LH: loop header
LB: loop body
LE: loop exit
PB: predicated region body
PF: predicated region fallthrough
CT: control target
= control target key end

     0   :  { %vm7_vm0 = vcmask 523264   ;;  %s39_s0 = inlined_call_operand.vmem [shape: f32[256], index: 0, kind: input, shape index: {}]   ;;  %s40_s1 = inlined_call_operand.vmem [shape: f32[4,64], index: 1, kind: output, shape index: {}]  }
   0x1   :  { %v4_v0 = vld [vmem:[%s39_s0] sm:$0x3]  ;;  %s22_s0 = smov 64  }
   0x2   :  { %5 = vst [vmem:[#allocation1] sm:$0x3] %v4_v0 }
   0x9   :  { %v9_v1 = vld [vmem:[#allocation1] sm:$0x3]  }
   0xa   :  { %v6_v2 = vld [vmem:[#allocation1] sm:$0x3]   ;;  %10 = vrot.lane.b32.xlu0 %v9_v1, %s22_s0 }
   0xb   :  { %8 = vst.msk [vmem:[#allocation0] ss:$2 sm:$0x3] %vm7_vm0, %v6_v2  }
  0x7c   :  { %v11_v3 = vpop.permute.xlu0 %10  }
  0x7d   :  { %14 = vst.msk [vmem:[#allocation0 + $0x1] ss:$2 sm:$0x3] %vm7_vm0, %v11_v3  }
  0x84   :  { %v18_v4 = vld [vmem:[#allocation0] sm:$0xf] }
  0x85   :  { %20 = vst [vmem:[%s40_s1] sm:$0xf] %v18_v4 }

// kernel: tile.13
= control target key start
LH: loop header
LB: loop body
LE: loop exit
PB: predicated region body
PF: predicated region fallthrough
CT: control target
= control target key end

     0   :  { %s22_s0 = inlined_call_operand.vmem [shape: f32[64], index: 0, kind: input, shape index: {}]   ;;  %s23_s1 = inlined_call_operand.vmem [shape: f32[4,64], index: 1, kind: output, shape index: {}]  }
   0x1   :  { %v4_v0 = vld [vmem:[%s22_s0] ss:$0 sm:$0xff] }
   0x2   :  { %5 = vst [vmem:[%s23_s1] sm:$0xf] %v4_v0 }

// kernel: tile.14
= control target key start
LH: loop header
LB: loop body
LE: loop exit
PB: predicated region body
PF: predicated region fallthrough
CT: control target
= control target key end

     0   :  { %s6_s8 = smov 3  ;;  %vm8_vm0 = vcmask 523264   ;;  %s30_s9 = smov 64   ;;  %vm15_vm1 = vcmask 1048064   ;;  %s50_s0 = inlined_call_operand.vmem [shape: f32[4,64], index: 0, kind: input, shape index: {}]   ;;  %s51_s1 = inlined_call_operand.vmem [shape: f32[1,256], index: 1, kind: output, shape index: {}]  }
   0x1   :  { %v4_v0 = vld [vmem:[%s50_s0] sm:$0xf]  ;;  %s11_s0 = smov 3 }
   0x2   :  { %5 = vst [vmem:[#allocation1] sm:$0xf] %v4_v0 }
   0x9   :  { %v12_v1 = vld [vmem:[#allocation1 + $0x1] ss:$2 sm:%s11_s0]   ;;  %v7_v2 = vld [vmem:[#allocation1] ss:$2 sm:%s6_s8]  }
   0xa   :  { %13 = vrot.lane.b32.xlu0 %v12_v1, %s30_s9  ;;  %9 = vst.msk [vmem:[#allocation0] ss:$8 sm:$0x3] %vm8_vm0, %v7_v2  }
  0x7c   :  { %v14_v3 = vpop.permute.xlu0 %13  }
  0x7d   :  { %16 = vst.msk [vmem:[#allocation0] ss:$8 sm:$0x3] %vm15_vm1, %v14_v3  }
  0x84   :  { %v20_v4 = vld [vmem:[#allocation0] sm:$0x1]  ;;  %v24_v5 = vld [vmem:[#allocation0 + $0x8] sm:$0x1] }
  0x85   :  { %22 = vst [vmem:[%s51_s1] sm:$0x1] %v20_v4  ;;  %28 = vst [vmem:[%s51_s1 + $0x1] sm:$0x1] %v24_v5 }

// kernel: basic_block_forward.2
= control target key start
LH: loop header
LB: loop body
LE: loop exit
PB: predicated region body
PF: predicated region fallthrough
CT: control target
= control target key end

     0   :  { %v804_v1 = vmov 0   ;;  %v805_v25 = vmov 0.0   ;;  %s1084_s1 = inlined_call_operand.vmem [shape: bf16[128,256], index: 1, kind: input, shape index: {}]   ;;  %s1085_s0 = inlined_call_operand.vmem [shape: bf16[128,128], index: 0, kind: input, shape index: {}]   ;;  %s1086_s2 = inlined_call_operand.vmem [shape: f32[8,256], index: 2, kind: output, shape index: {}]  }
   0x1   :  { %v772_v0 = vld [vmem:[%s1084_s1 + $0x4] ss:$8 sps:$4 sm:$0xff]   ;;  %210 = vmatprep.mubr.bf16.mxu0 %v804_v1  ;;  %250 = vmatprep.mubr.bf16.mxu1 %v804_v1  ;;  %v774_v2 = vld [vmem:[%s1084_s1] ss:$8 sps:$4 sm:$0xff]   ;;  %v775_v3 = vld [vmem:[%s1084_s1 + $0x14] ss:$8 sps:$4 sm:$0xff]   ;;  %16 = vst [vmem:[%s1086_s2] sm:$0xff] %v805_v25 }
   0x2   :  { %178 = vmatprep.subr.bf16.mxu0 %v772_v0  ;;  %753 = vmatprep.subr.bf16.mxu1 %v772_v0  ;;  %v777_v4 = vld [vmem:[%s1084_s1 + $0x10] ss:$8 sps:$4 sm:$0xff]   ;;  %v778_v5 = vld [vmem:[%s1084_s1 + $0x24] ss:$8 sps:$4 sm:$0xff]   ;;  %v780_v6 = vld [vmem:[%s1084_s1 + $0x20] ss:$8 sps:$4 sm:$0xff]  }
   0x3   :  { %179 = vmatpush1.bf16.msra.mxu0 %v774_v2  ;;  %761 = vmatpush1.bf16.msra.mxu1 %v774_v2  ;;  %v781_v7 = vld [vmem:[%s1084_s1 + $0x34] ss:$8 sps:$4 sm:$0xff]   ;;  %v783_v8 = vld [vmem:[%s1084_s1 + $0x30] ss:$8 sps:$4 sm:$0xff]   ;;  %v784_v9 = vld [vmem:[%s1084_s1 + $0x44] ss:$8 sps:$4 sm:$0xff]  }
   0x4   :  { %180 = vmatprep.subr.bf16.mxu0 %v775_v3  ;;  %754 = vmatprep.subr.bf16.mxu1 %v775_v3  ;;  %v786_v10 = vld [vmem:[%s1084_s1 + $0x40] ss:$8 sps:$4 sm:$0xff]   ;;  %v787_v11 = vld [vmem:[%s1084_s1 + $0x54] ss:$8 sps:$4 sm:$0xff]   ;;  %v789_v12 = vld [vmem:[%s1084_s1 + $0x50] ss:$8 sps:$4 sm:$0xff]  }
   0x5   :  { %v790_v13 = vld [vmem:[%s1084_s1 + $0x64] ss:$8 sps:$4 sm:$0xff]   ;;  %v792_v14 = vld [vmem:[%s1084_s1 + $0x60] ss:$8 sps:$4 sm:$0xff]   ;;  %v793_v15 = vld [vmem:[%s1084_s1 + $0x74] ss:$8 sps:$4 sm:$0xff]  }
   0x6   :  { %v795_v16 = vld [vmem:[%s1084_s1 + $0x70] ss:$8 sps:$4 sm:$0xff]   ;;  %v796_v17 = vld [vmem:[%s1085_s0] sm:$0xff]   ;;  %v798_v19 = vld [vmem:[%s1085_s0 + $0x8] sm:$0xff]   ;;  %17 = vst [vmem:[%s1086_s2 + $0x8] sm:$0xff] %v805_v25 }
   0x7   :  { %181 = vmatpush1.bf16.msra.mxu0 %v777_v4  ;;  %762 = vmatpush1.bf16.msra.mxu1 %v777_v4  ;;  %v797_v18 = vld [vmem:[%s1085_s0 + $0x20] sm:$0xff]   ;;  %v799_v20 = vld [vmem:[%s1085_s0 + $0x28] sm:$0xff]   ;;  %v800_v21 = vld [vmem:[%s1085_s0 + $0x10] sm:$0xff]  }
   0x8   :  { %182 = vmatprep.subr.bf16.mxu0 %v778_v5  ;;  %755 = vmatprep.subr.bf16.mxu1 %v778_v5  ;;  %v801_v22 = vld [vmem:[%s1085_s0 + $0x30] sm:$0xff]   ;;  %v802_v23 = vld [vmem:[%s1085_s0 + $0x18] sm:$0xff]  }
   0x9   :  { %v803_v24 = vld [vmem:[%s1085_s0 + $0x38] sm:$0xff]  }
   0xb   :  { %183 = vmatpush1.bf16.msra.mxu0 %v780_v6  ;;  %763 = vmatpush1.bf16.msra.mxu1 %v780_v6 }
   0xc   :  { %184 = vmatprep.subr.bf16.mxu0 %v781_v7  ;;  %756 = vmatprep.subr.bf16.mxu1 %v781_v7 }
   0xf   :  { %185 = vmatpush1.bf16.msra.mxu0 %v783_v8  ;;  %764 = vmatpush1.bf16.msra.mxu1 %v783_v8 }
  0x10   :  { %186 = vmatprep.subr.bf16.mxu0 %v784_v9  ;;  %757 = vmatprep.subr.bf16.mxu1 %v784_v9 }
  0x13   :  { %187 = vmatpush1.bf16.msra.mxu0 %v786_v10  ;;  %765 = vmatpush1.bf16.msra.mxu1 %v786_v10 }
  0x14   :  { %188 = vmatprep.subr.bf16.mxu0 %v787_v11  ;;  %758 = vmatprep.subr.bf16.mxu1 %v787_v11 }
  0x17   :  { %189 = vmatpush1.bf16.msra.mxu0 %v789_v12  ;;  %766 = vmatpush1.bf16.msra.mxu1 %v789_v12  ;;  %v806_v12 = vmov 1966171168  }
  0x18   :  { %190 = vmatprep.subr.bf16.mxu0 %v790_v13  ;;  %759 = vmatprep.subr.bf16.mxu1 %v790_v13  ;;  %v908_v13 = vunpack.c.l.s4 %v806_v12 }
  0x1b   :  { %191 = vmatpush1.bf16.msra.mxu0 %v792_v14  ;;  %767 = vmatpush1.bf16.msra.mxu1 %v792_v14  ;;  %v674_v14 = vlaneseq }
  0x1c   :  { %192 = vmatprep.subr.bf16.mxu0 %v793_v15  ;;  %760 = vmatprep.subr.bf16.mxu1 %v793_v15 }
  0x1d   :  { %vm689_vm0 = vcmp.lt.s32.totalorder %v674_v14, 256 }
  0x1f   :  { %193 = vmatpush1.bf16.msra.mxu0 %v795_v16  ;;  %768 = vmatpush1.bf16.msra.mxu1 %v795_v16 }
  0x22   :  { %211 = vmatmul.mubr.bf16.vlgmr.msra.gmra.mrb[0].mxu0 %v796_v17  ;;  %251 = vmatmul.mubr.bf16.vlgmr.msra.gmra.mrb[0].mxu1 %v797_v18 }
  0x23   :  { %220 = vmatprep.mubr.bf16.mxu0 %v804_v1  ;;  %260 = vmatprep.mubr.bf16.mxu1 %v804_v1 }
  0x2a   :  { %221 = vmatmul.mubr.bf16.gmra.mrb[4].mxu0 %v798_v19  ;;  %261 = vmatmul.mubr.bf16.gmra.mrb[4].mxu1 %v799_v20 }
  0x2b   :  { %230 = vmatprep.mubr.bf16.mxu0 %v804_v1  ;;  %270 = vmatprep.mubr.bf16.mxu1 %v804_v1 }
  0x32   :  { %231 = vmatmul.mubr.bf16.gmra.mrb[8].mxu0 %v800_v21  ;;  %271 = vmatmul.mubr.bf16.gmra.mrb[8].mxu1 %v801_v22 }
  0x33   :  { %240 = vmatprep.mubr.bf16.mxu0 %v804_v1  ;;  %280 = vmatprep.mubr.bf16.mxu1 %v804_v1 }
  0x3a   :  { %241 = vmatmul.mubr.bf16.gmra.mrb[12].mxu0 %v802_v23  ;;  %281 = vmatmul.mubr.bf16.gmra.mrb[12].mxu1 %v803_v24  ;;  %v673_v23 = vunpack.c.0.s8 %v908_v13  ;;  %v912_v24 = vshrl.u32 %v674_v14, 7 }
  0xf5   :  { %v212_v26 = vpop.f32.mrb[0].mxu0  ;;  %v252_v27 = vpop.f32.mrb[0].mxu1 }
  0xf6   :  { %v518_v28 = vmul.f32 %v252_v27, %v252_v27  ;;  %v214_v29 = vpop.f32.mrb[1].mxu0  ;;  %v254_v30 = vpop.f32.mrb[1].mxu1  ;;  %v346_v31 = vmul.f32 %v212_v26, %v212_v26 }
  0xf7   :  { %v347_v32 = vmul.f32 %v214_v29, %v214_v29  ;;  %v519_v33 = vmul.f32 %v254_v30, %v254_v30  ;;  %v216_v34 = vpop.f32.mrb[2].mxu0  ;;  %v256_v35 = vpop.f32.mrb[2].mxu1 }
  0xf8   :  { %v330_v36 = vadd.f32 %v216_v34, %v212_v26  ;;  %v348_v37 = vmul.f32 %v216_v34, %v216_v34  ;;  %v502_v38 = vadd.f32 %v256_v35, %v252_v27  ;;  %v520_v39 = vmul.f32 %v256_v35, %v256_v35  ;;  %v218_v40 = vpop.f32.mrb[3].mxu0  ;;  %v258_v41 = vpop.f32.mrb[3].mxu1 }
  0xf9   :  { %v337_v42 = vadd.f32 %v218_v40, %v214_v29  ;;  %v349_v43 = vmul.f32 %v218_v40, %v218_v40  ;;  %v509_v44 = vadd.f32 %v258_v41, %v254_v30  ;;  %v521_v45 = vmul.f32 %v258_v41, %v258_v41 }
  0xfa   :  { %v331_v46 = vrot.slane %v330_v36, 4  ;;  %v350_v47 = vadd.f32 %v348_v37, %v346_v31  ;;  %v503_v48 = vrot.slane %v502_v38, 4  ;;  %v522_v49 = vadd.f32 %v520_v39, %v518_v28 }
  0xfb   :  { %v338_v50 = vrot.slane %v337_v42, 4  ;;  %v357_v51 = vadd.f32 %v349_v43, %v347_v32  ;;  %v510_v52 = vrot.slane %v509_v44, 4  ;;  %v529_v53 = vadd.f32 %v521_v45, %v519_v33 }
  0xfc   :  { %v332_v54 = vadd.f32 %v331_v46, %v330_v36  ;;  %v351_v55 = vrot.slane %v350_v47, 4  ;;  %v504_v56 = vadd.f32 %v503_v48, %v502_v38  ;;  %v523_v57 = vrot.slane %v522_v49, 4 }
  0xfd   :  { %v339_v58 = vadd.f32 %v338_v50, %v337_v42  ;;  %v358_v59 = vrot.slane %v357_v51, 4  ;;  %v511_v60 = vadd.f32 %v510_v52, %v509_v44  ;;  %v530_v61 = vrot.slane %v529_v53, 4  ;;  %v222_v62 = vpop.f32.mrb[4].mxu0  ;;  %v262_v63 = vpop.f32.mrb[4].mxu1 }
  0xfe   :  { %v333_v0 = vrot.slane %v332_v54, 2  ;;  %v352_v1 = vadd.f32 %v351_v55, %v350_v47  ;;  %v505_v2 = vrot.slane %v504_v56, 2  ;;  %v524_v3 = vadd.f32 %v523_v57, %v522_v49  ;;  %v224_v4 = vpop.f32.mrb[5].mxu0  ;;  %v264_v5 = vpop.f32.mrb[5].mxu1 }
  0xff   :  { %v340_v6 = vrot.slane %v339_v58, 2  ;;  %v359_v7 = vadd.f32 %v358_v59, %v357_v51  ;;  %v226_v8 = vpop.f32.mrb[6].mxu0  ;;  %v266_v9 = vpop.f32.mrb[6].mxu1  ;;  %v512_v17 = vrot.slane %v511_v60, 2  ;;  %v531_v18 = vadd.f32 %v530_v61, %v529_v53 }
 0x100   :  { %v228_v10 = vpop.f32.mrb[7].mxu0  ;;  %v268_v11 = vpop.f32.mrb[7].mxu1  ;;  %v334_v15 = vadd.f32 %v333_v0, %v332_v54  ;;  %v353_v16 = vrot.slane %v352_v1, 2  ;;  %v506_v19 = vadd.f32 %v505_v2, %v504_v56  ;;  %v525_v20 = vrot.slane %v524_v3, 2 }
 0x101   :  { %v341_v21 = vadd.f32 %v340_v6, %v339_v58  ;;  %v360_v22 = vrot.slane %v359_v7, 2  ;;  %v916_v27 = vadd.f32 %v512_v17, %v511_v60  ;;  %v532_v28 = vrot.slane %v531_v18, 2 }
 0x102   :  { %v335_v25 = vrot.slane %v334_v15, 1  ;;  %v914_v26 = vadd.f32 %v353_v16, %v352_v1  ;;  %v507_v31 = vrot.slane %v506_v19, 1  ;;  %v922_v32 = vadd.f32 %v525_v20, %v524_v3 }
 0x103   :  { %v342_v33 = vrot.slane %v341_v21, 1  ;;  %v561_v34 = vmul.f32 %v262_v63, %v262_v63  ;;  %v928_v37 = vadd.f32 %v360_v22, %v359_v7  ;;  %v389_v38 = vmul.f32 %v222_v62, %v222_v62 }
 0x104   :  { %v390_v39 = vmul.f32 %v224_v4, %v224_v4  ;;  %v562_v40 = vmul.f32 %v264_v5, %v264_v5  ;;  %v373_v43 = vadd.f32 %v226_v8, %v222_v62  ;;  %v391_v44 = vmul.f32 %v226_v8, %v226_v8 }
 0x105   :  { %v918_v29 = vpop.f32.mrb[8].mxu0  ;;  %v920_v30 = vpop.f32.mrb[8].mxu1  ;;  %v545_v45 = vadd.f32 %v266_v9, %v262_v63  ;;  %v563_v46 = vmul.f32 %v266_v9, %v266_v9  ;;  %v380_v49 = vadd.f32 %v228_v10, %v224_v4  ;;  %v392_v50 = vmul.f32 %v228_v10, %v228_v10 }
 0x106   :  { %v924_v35 = vpop.f32.mrb[9].mxu0  ;;  %v926_v36 = vpop.f32.mrb[9].mxu1  ;;  %v552_v51 = vadd.f32 %v268_v11, %v264_v5  ;;  %v564_v52 = vmul.f32 %v268_v11, %v268_v11  ;;  %v514_v53 = vrot.slane %v916_v27, 1  ;;  %v374_v54 = vrot.slane %v373_v43, 4 }
 0x107   :  { %v930_v41 = vpop.f32.mrb[10].mxu0  ;;  %v932_v42 = vpop.f32.mrb[10].mxu1  ;;  %v393_v55 = vadd.f32 %v391_v44, %v389_v38  ;;  %v565_v56 = vadd.f32 %v563_v46, %v561_v34  ;;  %v939_v57 = vadd.f32 %v532_v28, %v531_v18  ;;  %v381_v58 = vrot.slane %v380_v49, 4 }
 0x108   :  { %v934_v47 = vpop.f32.mrb[11].mxu0  ;;  %v936_v48 = vpop.f32.mrb[11].mxu1  ;;  %v400_v59 = vadd.f32 %v392_v50, %v390_v39  ;;  %v572_v60 = vadd.f32 %v564_v52, %v562_v40  ;;  %v336_v61 = vadd.f32 %v335_v25, %v334_v15  ;;  %v355_v62 = vrot.slane %v914_v26, 1 }
 0x109   :  { %v375_v63 = vadd.f32 %v374_v54, %v373_v43  ;;  %v394_v0 = vrot.slane %v393_v55, 4  ;;  %v546_v1 = vrot.slane %v545_v45, 4  ;;  %v382_v2 = vadd.f32 %v381_v58, %v380_v49 }
 0x10a   :  { %v401_v3 = vrot.slane %v400_v59, 4  ;;  %v553_v4 = vrot.slane %v552_v51, 4  ;;  %v566_v9 = vrot.slane %v565_v56, 4  ;;  %v573_v10 = vrot.slane %v572_v60, 4 }
 0x10b   :  { %v376_v7 = vrot.slane %v375_v63, 2  ;;  %v395_v8 = vadd.f32 %v394_v0, %v393_v55  ;;  %v950_v15 = vadd.f32 %v507_v31, %v506_v19  ;;  %v527_v16 = vrot.slane %v922_v32, 1 }
 0x10c   :  { %v383_v17 = vrot.slane %v382_v2, 2  ;;  %v402_v18 = vadd.f32 %v401_v3, %v400_v59  ;;  %v343_v25 = vadd.f32 %v342_v33, %v341_v21  ;;  %v362_v28 = vrot.slane %v928_v37, 1 }
 0x10d   :  { %v942_v5 = vpop.f32.mrb[12].mxu0  ;;  %v944_v6 = vpop.f32.mrb[12].mxu1  ;;  %v377_v34 = vadd.f32 %v376_v7, %v375_v63  ;;  %v396_v38 = vrot.slane %v395_v8, 2  ;;  %v547_v43 = vadd.f32 %v546_v1, %v545_v45  ;;  %v554_v44 = vadd.f32 %v553_v4, %v552_v51 }
 0x10e   :  { %v946_v11 = vpop.f32.mrb[13].mxu0  ;;  %v948_v12 = vpop.f32.mrb[13].mxu1  ;;  %v384_v19 = vadd.f32 %v383_v17, %v382_v2  ;;  %v403_v31 = vrot.slane %v402_v18, 2  ;;  %v567_v50 = vadd.f32 %v566_v9, %v565_v56  ;;  %v574_v52 = vadd.f32 %v573_v10, %v572_v60 }
 0x10f   :  { %v953_v20 = vpop.f32.mrb[14].mxu0  ;;  %v955_v22 = vpop.f32.mrb[14].mxu1  ;;  %v378_v46 = vrot.slane %v377_v34, 1  ;;  %v397_v49 = vadd.f32 %v396_v38, %v395_v8  ;;  %v963_v54 = vadd.f32 %v514_v53, %v916_v27  ;;  %v534_v21 = vrot.slane %v939_v57, 1 }
 0x110   :  { %v958_v39 = vpop.f32.mrb[15].mxu0  ;;  %v960_v40 = vpop.f32.mrb[15].mxu1  ;;  %v385_v33 = vrot.slane %v384_v19, 1  ;;  %v404_v55 = vadd.f32 %v403_v31, %v402_v18  ;;  %v356_v58 = vadd.f32 %v355_v62, %v914_v26  ;;  %v363_v59 = vadd.f32 %v362_v28, %v928_v37 }
 0x111   :  { %v379_v63 = vadd.f32 %v378_v46, %v377_v34  ;;  %v398_v45 = vrot.slane %v397_v49, 1  ;;  %v548_v0 = vrot.slane %v547_v43, 2  ;;  %v555_v2 = vrot.slane %v554_v44, 2 }
 0x112   :  { %v386_v1 = vadd.f32 %v385_v33, %v384_v19  ;;  %v405_v51 = vrot.slane %v404_v55, 1  ;;  %v568_v60 = vrot.slane %v567_v50, 2  ;;  %v575_v27 = vrot.slane %v574_v52, 2 }
 0x113   :  { %v968_v3 = vadd.f32 %v379_v63, %v336_v61  ;;  %v399_v56 = vadd.f32 %v398_v45, %v397_v49  ;;  %v432_v7 = vmul.f32 %v918_v29, %v918_v29  ;;  %v604_v26 = vmul.f32 %v920_v30, %v920_v30 }
 0x114   :  { %v970_v53 = vadd.f32 %v386_v1, %v343_v25  ;;  %v406_v4 = vadd.f32 %v405_v51, %v404_v55  ;;  %v433_v62 = vmul.f32 %v924_v35, %v924_v35  ;;  %v605_v61 = vmul.f32 %v926_v36, %v926_v36 }
 0x115   :  { %v976_v37 = vadd.f32 %v399_v56, %v356_v58  ;;  %v416_v8 = vadd.f32 %v930_v41, %v918_v29  ;;  %v434_v10 = vmul.f32 %v930_v41, %v930_v41  ;;  %v588_v17 = vadd.f32 %v932_v42, %v920_v30 }
 0x116   :  { %v984_v9 = vadd.f32 %v406_v4, %v363_v59  ;;  %v606_v18 = vmul.f32 %v932_v42, %v932_v42  ;;  %v423_v28 = vadd.f32 %v934_v47, %v924_v35  ;;  %v435_v34 = vmul.f32 %v934_v47, %v934_v47 }
 0x117   :  { %v417_v25 = vrot.slane %v416_v8, 4  ;;  %v595_v29 = vadd.f32 %v936_v48, %v926_v36  ;;  %v549_v38 = vadd.f32 %v548_v0, %v547_v43  ;;  %v436_v19 = vadd.f32 %v434_v10, %v432_v7 }
 0x118   :  { %v608_v31 = vadd.f32 %v606_v18, %v604_v26  ;;  %v607_v41 = vmul.f32 %v936_v48, %v936_v48  ;;  %v556_v30 = vadd.f32 %v555_v2, %v554_v44  ;;  %v424_v49 = vrot.slane %v423_v28, 4 }
 0x119   :  { %v418_v46 = vadd.f32 %v417_v25, %v416_v8  ;;  %v443_v42 = vadd.f32 %v435_v34, %v433_v62  ;;  %v569_v33 = vadd.f32 %v568_v60, %v567_v50  ;;  %v576_v55 = vadd.f32 %v575_v27, %v574_v52 }
 0x11a   :  { %v437_v58 = vrot.slane %v436_v19, 4  ;;  %v615_v35 = vadd.f32 %v607_v41, %v605_v61  ;;  %v589_v63 = vrot.slane %v588_v17, 4  ;;  %v425_v47 = vadd.f32 %v424_v49, %v423_v28 }
 0x11b   :  { %v419_v59 = vrot.slane %v418_v46, 2  ;;  %v444_v45 = vrot.slane %v443_v42, 4  ;;  %v1003_v36 = vadd.f32 %v527_v16, %v922_v32  ;;  %v1006_v43 = vadd.f32 %v534_v21, %v939_v57 }
 0x11c   :  { %v438_v48 = vadd.f32 %v437_v58, %v436_v19  ;;  %v596_v44 = vrot.slane %v595_v29, 4  ;;  %v550_v0 = vrot.slane %v549_v38, 1  ;;  %v426_v50 = vrot.slane %v425_v47, 2 }
 0x11d   :  { %v420_v1 = vadd.f32 %v419_v59, %v418_v46  ;;  %v445_v52 = vadd.f32 %v444_v45, %v443_v42  ;;  %v570_v51 = vrot.slane %v569_v33, 1  ;;  %v557_v2 = vrot.slane %v556_v30, 1 }
 0x11e   :  { %v577_v56 = vrot.slane %v576_v55, 1  ;;  %v439_v60 = vrot.slane %v438_v48, 2  ;;  %v590_v4 = vadd.f32 %v589_v63, %v588_v17  ;;  %v427_v7 = vadd.f32 %v426_v50, %v425_v47 }
 0x11f   :  { %v421_v27 = vrot.slane %v420_v1, 1  ;;  %v446_v26 = vrot.slane %v445_v52, 2  ;;  %v609_v32 = vrot.slane %v608_v31, 4  ;;  %v1008_v16 = vadd.f32 %v596_v44, %v595_v29 }
 0x120   :  { %v440_v62 = vadd.f32 %v439_v60, %v438_v48  ;;  %v616_v57 = vrot.slane %v615_v35, 4  ;;  %v1010_v21 = vadd.f32 %v550_v0, %v549_v38  ;;  %v428_v8 = vrot.slane %v427_v7, 1 }
 0x121   :  { %v422_v61 = vadd.f32 %v421_v27, %v420_v1  ;;  %v447_v10 = vadd.f32 %v446_v26, %v445_v52  ;;  %v1012_v18 = vadd.f32 %v570_v51, %v569_v33  ;;  %v1014_v25 = vadd.f32 %v557_v2, %v556_v30 }
 0x122   :  { %v1016_v28 = vadd.f32 %v577_v56, %v576_v55  ;;  %v441_v34 = vrot.slane %v440_v62, 1  ;;  %v591_v19 = vrot.slane %v590_v4, 2  ;;  %v429_v41 = vadd.f32 %v428_v8, %v427_v7 }
 0x123   :  { %v1019_v17 = vadd.f32 %v422_v61, %v968_v3  ;;  %v448_v29 = vrot.slane %v447_v10, 1  ;;  %v610_v49 = vadd.f32 %v609_v32, %v608_v31  ;;  %v598_v38 = vrot.slane %v1008_v16, 2 }
 0x124   :  { %v442_v46 = vadd.f32 %v441_v34, %v440_v62  ;;  %v617_v42 = vadd.f32 %v616_v57, %v615_v35  ;;  %v1023_v58 = vadd.f32 %v429_v41, %v970_v53  ;;  %v475_v30 = vmul.f32 %v942_v5, %v942_v5 }
 0x125   :  { %v449_v33 = vadd.f32 %v448_v29, %v447_v10  ;;  %v647_v55 = vmul.f32 %v944_v6, %v944_v6  ;;  %v476_v59 = vmul.f32 %v946_v11, %v946_v11  ;;  %v648_v31 = vmul.f32 %v948_v12, %v948_v12 }
 0x126   :  { %v1030_v3 = vadd.f32 %v442_v46, %v976_v37  ;;  %v459_v53 = vadd.f32 %v953_v20, %v942_v5  ;;  %v477_v63 = vmul.f32 %v953_v20, %v953_v20  ;;  %v631_v47 = vadd.f32 %v955_v22, %v944_v6 }
 0x127   :  { %v1039_v35 = vadd.f32 %v449_v33, %v984_v9  ;;  %v649_v37 = vmul.f32 %v955_v22, %v955_v22  ;;  %v466_v48 = vadd.f32 %v958_v39, %v946_v11  ;;  %v478_v44 = vmul.f32 %v958_v39, %v958_v39 }
 0x128   :  { %v460_v45 = vrot.slane %v459_v53, 4  ;;  %v638_v5 = vadd.f32 %v960_v40, %v948_v12  ;;  %v479_v9 = vadd.f32 %v477_v63, %v475_v30  ;;  %v632_v0 = vrot.slane %v631_v47, 4 }
 0x129   :  { %v651_v1 = vadd.f32 %v649_v37, %v647_v55  ;;  %v650_v20 = vmul.f32 %v960_v40, %v960_v40  ;;  %v467_v50 = vrot.slane %v466_v48, 4  ;;  %v486_v52 = vadd.f32 %v478_v44, %v476_v59 }
 0x12a   :  { %v461_v6 = vadd.f32 %v460_v45, %v459_v53  ;;  %v639_v22 = vrot.slane %v638_v5, 4  ;;  %v480_v51 = vrot.slane %v479_v9, 4  ;;  %v633_v2 = vadd.f32 %v632_v0, %v631_v47 }
 0x12b   :  { %v652_v56 = vrot.slane %v651_v1, 4  ;;  %v658_v11 = vadd.f32 %v650_v20, %v648_v31  ;;  %v468_v27 = vadd.f32 %v467_v50, %v466_v48  ;;  %v487_v39 = vrot.slane %v486_v52, 4 }
 0x12c   :  { %v462_v60 = vrot.slane %v461_v6, 2  ;;  %v640_v7 = vadd.f32 %v639_v22, %v638_v5  ;;  %v481_v26 = vadd.f32 %v480_v51, %v479_v9  ;;  %v634_v12 = vrot.slane %v633_v2, 2 }
 0x12d   :  { %v653_v62 = vadd.f32 %v652_v56, %v651_v1  ;;  %v659_v32 = vrot.slane %v658_v11, 4  ;;  %v592_v57 = vadd.f32 %v591_v19, %v590_v4  ;;  %v469_v8 = vrot.slane %v468_v27, 2 }
 0x12e   :  { %v463_v61 = vadd.f32 %v462_v60, %v461_v6  ;;  %v488_v40 = vadd.f32 %v487_v39, %v486_v52  ;;  %v611_v10 = vrot.slane %v610_v49, 2  ;;  %v618_v34 = vrot.slane %v617_v42, 2 }
 0x12f   :  { %v482_v41 = vrot.slane %v481_v26, 2  ;;  %v660_v29 = vadd.f32 %v659_v32, %v658_v11  ;;  %v470_v33 = vadd.f32 %v469_v8, %v468_v27  ;;  %v641_v55 = vrot.slane %v640_v7, 2 }
 0x130   :  { %v464_v46 = vrot.slane %v463_v61, 1  ;;  %v489_v30 = vrot.slane %v488_v40, 2  ;;  %v599_v59 = vadd.f32 %v598_v38, %v1008_v16  ;;  %v635_v53 = vadd.f32 %v634_v12, %v633_v2 }
 0x131   :  { %v483_v31 = vadd.f32 %v482_v41, %v481_v26  ;;  %v654_v63 = vrot.slane %v653_v62, 2  ;;  %v471_v37 = vrot.slane %v470_v33, 1  ;;  %v661_v4 = vrot.slane %v660_v29, 2 }
 0x132   :  { %v465_v47 = vadd.f32 %v464_v46, %v463_v61  ;;  %v490_v45 = vadd.f32 %v489_v30, %v488_v40  ;;  %v593_v19 = vrot.slane %v592_v57, 1  ;;  %v612_v48 = vadd.f32 %v611_v10, %v610_v49 }
 0x133   :  { %v619_v44 = vadd.f32 %v618_v34, %v617_v42  ;;  %v484_v5 = vrot.slane %v483_v31, 1  ;;  %v472_v0 = vadd.f32 %v471_v37, %v470_v33  ;;  %v642_v20 = vadd.f32 %v641_v55, %v640_v7 }
 0x134   :  { %v473_v9 = vadd.f32 %v465_v47, %v1019_v17  ;;  %v491_v1 = vrot.slane %v490_v45, 1  ;;  %v600_v6 = vrot.slane %v599_v59, 1  ;;  %v636_v52 = vrot.slane %v635_v53, 1 }
 0x135   :  { %v485_v50 = vadd.f32 %v484_v5, %v483_v31  ;;  %v655_v16 = vadd.f32 %v654_v63, %v653_v62  ;;  %v474_v22 = vadd.f32 %v472_v0, %v1023_v58  ;;  %v662_v2 = vadd.f32 %v661_v4, %v660_v29  ;;  %v751_v31 = vld [vmem:[%s1086_s2 + $0x1] ss:$8 sm:$0x3] }
 0x136   :  { %v516_v38 = vadd.f32 %v950_v15, %v473_v9  ;;  %v492_v51 = vadd.f32 %v491_v1, %v490_v45  ;;  %v594_v56 = vadd.f32 %v593_v19, %v592_v57  ;;  %v613_v11 = vrot.slane %v612_v48, 1 }
 0x137   :  { %v620_v49 = vrot.slane %v619_v44, 1  ;;  %v493_v42 = vadd.f32 %v485_v50, %v1030_v3  ;;  %v517_v27 = vadd.f32 %v963_v54, %v474_v22  ;;  %v643_v39 = vrot.slane %v642_v20, 1 }
 0x138   :  { %v559_v17 = vadd.f32 %v1010_v21, %v516_v38  ;;  %v494_v60 = vadd.f32 %v492_v51, %v1039_v35  ;;  %v601_v7 = vadd.f32 %v600_v6, %v599_v59  ;;  %v637_v15 = vadd.f32 %v636_v52, %v635_v53 }
 0x139   :  { %v536_v26 = vadd.f32 %v1003_v36, %v493_v42  ;;  %v656_v12 = vrot.slane %v655_v16, 1  ;;  %v560_v32 = vadd.f32 %v1014_v25, %v517_v27  ;;  %v663_v57 = vrot.slane %v662_v2, 1 }
 0x13a   :  { %v602_v58 = vadd.f32 %v594_v56, %v559_v17  ;;  %v537_v62 = vadd.f32 %v1006_v43, %v494_v60  ;;  %v614_v61 = vadd.f32 %v613_v11, %v612_v48  ;;  %v621_v3 = vadd.f32 %v620_v49, %v619_v44 }
 0x13b   :  { %v579_v21 = vadd.f32 %v1012_v18, %v536_v26  ;;  %v603_v54 = vadd.f32 %v601_v7, %v560_v32  ;;  %v644_v40 = vadd.f32 %v643_v39, %v642_v20  ;;  %v657_v34 = vadd.f32 %v656_v12, %v655_v16  ;;  %v667_v18 = vld [vmem:[%s1086_s2] ss:$8 sm:$0x3] }
 0x13c   :  { %v645_v8 = vadd.f32 %v637_v15, %v602_v58  ;;  %v580_v35 = vadd.f32 %v1016_v28, %v537_v62  ;;  %v664_v29 = vadd.f32 %v663_v57, %v662_v2  ;;  %v676_v43 = vsub.s32 %v673_v23, %v912_v24 }
 0x13d   :  { %v622_v10 = vadd.f32 %v614_v61, %v579_v21  ;;  %v646_v41 = vadd.f32 %v644_v40, %v603_v54 }
 0x13e   :  { %v623_v36 = vadd.f32 %v621_v3, %v580_v35 }
 0x13f   :  { %v665_v25 = vadd.f32 %v657_v34, %v622_v10  ;;  %v670_v33 = vcombine.low %v645_v8, %v646_v41 }
 0x140   :  { %v666_v46 = vadd.f32 %v664_v29, %v623_v36 }
 0x141   :  { %v677_v30 = vrot.slane %v670_v33, %v676_v43 }
 0x142   :  { %v697_v55 = vcombine.low %v665_v25, %v666_v46 }
 0x143   :  { %v684_v28 = vrot.slane %v677_v30, %v676_v43 }
 0x144   :  { %v704_v59 = vrot.slane %v697_v55, %v676_v43 }
 0x145   :  { %v686_v53 = vadd.f32 %v684_v28, %v667_v18 }
 0x146   :  { %v711_v13 = vrot.slane %v704_v59, %v676_v43 }
 0x147   :  { %691 = vst.msk [vmem:[%s1086_s2] ss:$8 sm:$0x3] %vm689_vm0, %v686_v53 }
 0x148   :  { %v713_v23 = vadd.f32 %v751_v31, %v711_v13 }
 0x14a   :  { %752 = vst.msk [vmem:[%s1086_s2 + $0x1] ss:$8 sm:$0x3] %vm689_vm0, %v713_v23 }

// kernel: basic_block_forward.3
= control target key start
LH: loop header
LB: loop body
LE: loop exit
PB: predicated region body
PF: predicated region fallthrough
CT: control target
= control target key end

     0   :  { %v692_v1 = vmov 0   ;;  %v325_v25 = vlaneseq  ;;  %s975_s1 = inlined_call_operand.vmem [shape: bf16[128,256], index: 1, kind: input, shape index: {}]   ;;  %s976_s0 = inlined_call_operand.vmem [shape: bf16[128,128], index: 0, kind: input, shape index: {}]   ;;  %s977_s2 = inlined_call_operand.vmem [shape: f32[1,256], index: 2, kind: input, shape index: {}]   ;;  %s978_s3 = inlined_call_operand.vmem [shape: f32[1,256], index: 3, kind: input, shape index: {}]   ;;  %s979_s4 = inlined_call_operand.vmem [shape: f32[64,128], index: 4, kind: output, shape index: {}]  }
   0x1   :  { %v660_v0 = vld [vmem:[%s975_s1 + $0x4] ss:$8 sps:$4 sm:$0xff]   ;;  %210 = vmatprep.mubr.bf16.mxu0 %v692_v1  ;;  %250 = vmatprep.mubr.bf16.mxu1 %v692_v1  ;;  %v662_v2 = vld [vmem:[%s975_s1] ss:$8 sps:$4 sm:$0xff]   ;;  %v663_v3 = vld [vmem:[%s975_s1 + $0x14] ss:$8 sps:$4 sm:$0xff]  }
   0x2   :  { %178 = vmatprep.subr.bf16.mxu0 %v660_v0  ;;  %642 = vmatprep.subr.bf16.mxu1 %v660_v0  ;;  %v665_v4 = vld [vmem:[%s975_s1 + $0x10] ss:$8 sps:$4 sm:$0xff]   ;;  %v666_v5 = vld [vmem:[%s975_s1 + $0x24] ss:$8 sps:$4 sm:$0xff]   ;;  %v668_v6 = vld [vmem:[%s975_s1 + $0x20] ss:$8 sps:$4 sm:$0xff]  }
   0x3   :  { %179 = vmatpush1.bf16.msra.mxu0 %v662_v2  ;;  %650 = vmatpush1.bf16.msra.mxu1 %v662_v2  ;;  %v669_v7 = vld [vmem:[%s975_s1 + $0x34] ss:$8 sps:$4 sm:$0xff]   ;;  %v671_v8 = vld [vmem:[%s975_s1 + $0x30] ss:$8 sps:$4 sm:$0xff]   ;;  %v672_v9 = vld [vmem:[%s975_s1 + $0x44] ss:$8 sps:$4 sm:$0xff]  }
   0x4   :  { %180 = vmatprep.subr.bf16.mxu0 %v663_v3  ;;  %643 = vmatprep.subr.bf16.mxu1 %v663_v3  ;;  %v674_v10 = vld [vmem:[%s975_s1 + $0x40] ss:$8 sps:$4 sm:$0xff]   ;;  %v675_v11 = vld [vmem:[%s975_s1 + $0x54] ss:$8 sps:$4 sm:$0xff]   ;;  %v677_v12 = vld [vmem:[%s975_s1 + $0x50] ss:$8 sps:$4 sm:$0xff]  }
   0x5   :  { %v678_v13 = vld [vmem:[%s975_s1 + $0x64] ss:$8 sps:$4 sm:$0xff]   ;;  %v680_v14 = vld [vmem:[%s975_s1 + $0x60] ss:$8 sps:$4 sm:$0xff]   ;;  %v681_v15 = vld [vmem:[%s975_s1 + $0x74] ss:$8 sps:$4 sm:$0xff]  }
   0x6   :  { %v683_v16 = vld [vmem:[%s975_s1 + $0x70] ss:$8 sps:$4 sm:$0xff]   ;;  %v684_v17 = vld [vmem:[%s976_s0] sm:$0xff]   ;;  %v686_v19 = vld [vmem:[%s976_s0 + $0x8] sm:$0xff]   ;;  %v336_v26 = vshrl.u32 %v325_v25, 7 }
   0x7   :  { %181 = vmatpush1.bf16.msra.mxu0 %v665_v4  ;;  %651 = vmatpush1.bf16.msra.mxu1 %v665_v4  ;;  %v685_v18 = vld [vmem:[%s976_s0 + $0x20] sm:$0xff]   ;;  %v687_v20 = vld [vmem:[%s976_s0 + $0x28] sm:$0xff]   ;;  %v688_v21 = vld [vmem:[%s976_s0 + $0x10] sm:$0xff]  }
   0x8   :  { %182 = vmatprep.subr.bf16.mxu0 %v666_v5  ;;  %644 = vmatprep.subr.bf16.mxu1 %v666_v5  ;;  %v689_v22 = vld [vmem:[%s976_s0 + $0x30] sm:$0xff]   ;;  %v690_v23 = vld [vmem:[%s976_s0 + $0x18] sm:$0xff]   ;;  %v337_v27 = vsub.s32 0, %v336_v26  ;;  %v323_v28 = vld [vmem:[%s977_s2] sm:$0x3]  ;;  %v341_v29 = vsub.s32 1, %v336_v26 }
   0x9   :  { %v691_v24 = vld [vmem:[%s976_s0 + $0x38] sm:$0xff]   ;;  %v324_v30 = vld [vmem:[%s978_s3] sm:$0x3]  ;;  %s693_s0 = smov 64  }
   0xa   :  { %v806_v31 = vrot.slane %v323_v28, %v337_v27  ;;  %v808_v32 = vrot.slane %v323_v28, %v341_v29  ;;  %v810_v33 = vrot.slane %v324_v30, %v337_v27  ;;  %v812_v36 = vrot.slane %v324_v30, %v341_v29 }
   0xb   :  { %183 = vmatpush1.bf16.msra.mxu0 %v668_v6  ;;  %652 = vmatpush1.bf16.msra.mxu1 %v668_v6 }
   0xc   :  { %184 = vmatprep.subr.bf16.mxu0 %v669_v7  ;;  %645 = vmatprep.subr.bf16.mxu1 %v669_v7 }
   0xf   :  { %185 = vmatpush1.bf16.msra.mxu0 %v671_v8  ;;  %653 = vmatpush1.bf16.msra.mxu1 %v671_v8 }
  0x10   :  { %186 = vmatprep.subr.bf16.mxu0 %v672_v9  ;;  %646 = vmatprep.subr.bf16.mxu1 %v672_v9 }
  0x13   :  { %187 = vmatpush1.bf16.msra.mxu0 %v674_v10  ;;  %654 = vmatpush1.bf16.msra.mxu1 %v674_v10 }
  0x14   :  { %188 = vmatprep.subr.bf16.mxu0 %v675_v11  ;;  %647 = vmatprep.subr.bf16.mxu1 %v675_v11 }
  0x17   :  { %189 = vmatpush1.bf16.msra.mxu0 %v677_v12  ;;  %655 = vmatpush1.bf16.msra.mxu1 %v677_v12 }
  0x18   :  { %190 = vmatprep.subr.bf16.mxu0 %v678_v13  ;;  %648 = vmatprep.subr.bf16.mxu1 %v678_v13 }
  0x1b   :  { %191 = vmatpush1.bf16.msra.mxu0 %v680_v14  ;;  %656 = vmatpush1.bf16.msra.mxu1 %v680_v14 }
  0x1c   :  { %192 = vmatprep.subr.bf16.mxu0 %v681_v15  ;;  %649 = vmatprep.subr.bf16.mxu1 %v681_v15 }
  0x1f   :  { %193 = vmatpush1.bf16.msra.mxu0 %v683_v16  ;;  %657 = vmatpush1.bf16.msra.mxu1 %v683_v16 }
  0x22   :  { %211 = vmatmul.mubr.bf16.vlgmr.msra.gmra.mrb[0].mxu0 %v684_v17  ;;  %251 = vmatmul.mubr.bf16.vlgmr.msra.gmra.mrb[0].mxu1 %v685_v18 }
  0x23   :  { %220 = vmatprep.mubr.bf16.mxu0 %v692_v1  ;;  %260 = vmatprep.mubr.bf16.mxu1 %v692_v1 }
  0x2a   :  { %221 = vmatmul.mubr.bf16.gmra.mrb[4].mxu0 %v686_v19  ;;  %261 = vmatmul.mubr.bf16.gmra.mrb[4].mxu1 %v687_v20 }
  0x2b   :  { %230 = vmatprep.mubr.bf16.mxu0 %v692_v1  ;;  %270 = vmatprep.mubr.bf16.mxu1 %v692_v1 }
  0x32   :  { %231 = vmatmul.mubr.bf16.gmra.mrb[8].mxu0 %v688_v21  ;;  %271 = vmatmul.mubr.bf16.gmra.mrb[8].mxu1 %v689_v22 }
  0x33   :  { %240 = vmatprep.mubr.bf16.mxu0 %v692_v1  ;;  %280 = vmatprep.mubr.bf16.mxu1 %v692_v1 }
  0x3a   :  { %241 = vmatmul.mubr.bf16.gmra.mrb[12].mxu0 %v690_v23  ;;  %281 = vmatmul.mubr.bf16.gmra.mrb[12].mxu1 %v691_v24 }
  0xf5   :  { %v212_v34 = vpop.f32.mrb[0].mxu0  ;;  %v252_v35 = vpop.f32.mrb[0].mxu1 }
  0xf6   :  { %v345_v37 = vmul.f32 %v806_v31, %v212_v34  ;;  %v378_v38 = vmul.f32 %v806_v31, %v252_v35  ;;  %v214_v39 = vpop.f32.mrb[1].mxu0  ;;  %v254_v40 = vpop.f32.mrb[1].mxu1 }
  0xf7   :  { %v346_v41 = vmul.f32 %v808_v32, %v214_v39  ;;  %v379_v42 = vmul.f32 %v808_v32, %v254_v40  ;;  %v216_v43 = vpop.f32.mrb[2].mxu0  ;;  %v256_v44 = vpop.f32.mrb[2].mxu1 }
  0xf8   :  { %v360_v45 = vadd.f32 %v810_v33, %v345_v37  ;;  %v382_v46 = vadd.f32 %v378_v38, %v810_v33  ;;  %v347_v47 = vmul.f32 %v806_v31, %v216_v43  ;;  %v380_v48 = vmul.f32 %v806_v31, %v256_v44  ;;  %v218_v49 = vpop.f32.mrb[3].mxu0  ;;  %v258_v50 = vpop.f32.mrb[3].mxu1 }
  0xf9   :  { %v361_v51 = vadd.f32 %v812_v36, %v346_v41  ;;  %v383_v52 = vadd.f32 %v379_v42, %v812_v36  ;;  %v348_v53 = vmul.f32 %v808_v32, %v218_v49  ;;  %v381_v54 = vmul.f32 %v808_v32, %v258_v50 }
  0xfa   :  { %v364_v55 = vmax.f32 %v360_v45, 0.0  ;;  %v386_v56 = vmax.f32 %v382_v46, 0.0  ;;  %v362_v57 = vadd.f32 %v810_v33, %v347_v47  ;;  %v384_v58 = vadd.f32 %v380_v48, %v810_v33 }
  0xfb   :  { %v365_v59 = vmax.f32 %v361_v51, 0.0  ;;  %v387_v60 = vmax.f32 %v383_v52, 0.0  ;;  %v363_v61 = vadd.f32 %v812_v36, %v348_v53  ;;  %v385_v62 = vadd.f32 %v381_v54, %v812_v36 }
  0xfc   :  { %v388_v63 = vmax.f32 %v384_v58, 0.0  ;;  %v366_v5 = vmax.f32 %v362_v57, 0.0 }
  0xfd   :  { %v389_v0 = vmax.f32 %v385_v62, 0.0  ;;  %v222_v1 = vpop.f32.mrb[4].mxu0  ;;  %v262_v2 = vpop.f32.mrb[4].mxu1  ;;  %v830_v3 = vmax.f32 %v386_v56, %v387_v60  ;;  %v832_v4 = vmax.f32 %v364_v55, %v365_v59  ;;  %v367_v10 = vmax.f32 %v363_v61, 0.0 }
  0xfe   :  { %v418_v6 = vmul.f32 %v806_v31, %v222_v1  ;;  %v224_v7 = vpop.f32.mrb[5].mxu0  ;;  %v440_v8 = vmul.f32 %v806_v31, %v262_v2  ;;  %v264_v9 = vpop.f32.mrb[5].mxu1 }
  0xff   :  { %v419_v11 = vmul.f32 %v808_v32, %v224_v7  ;;  %401 = vrot.lane.b32.xlu1 %v830_v3, %s693_s0  ;;  %v441_v12 = vmul.f32 %v808_v32, %v264_v9  ;;  %393 = vrot.lane.b32.xlu0 %v832_v4, %s693_s0  ;;  %v226_v13 = vpop.f32.mrb[6].mxu0  ;;  %v266_v14 = vpop.f32.mrb[6].mxu1  ;;  %v842_v15 = vmax.f32 %v388_v63, %v389_v0 }
 0x100   :  { %v422_v16 = vadd.f32 %v418_v6, %v810_v33  ;;  %v444_v17 = vadd.f32 %v440_v8, %v810_v33  ;;  %v420_v18 = vmul.f32 %v806_v31, %v226_v13  ;;  %v228_v19 = vpop.f32.mrb[7].mxu0  ;;  %v442_v20 = vmul.f32 %v806_v31, %v266_v14  ;;  %v268_v21 = vpop.f32.mrb[7].mxu1 }
 0x101   :  { %v423_v22 = vadd.f32 %v419_v11, %v812_v36  ;;  %v445_v23 = vadd.f32 %v441_v12, %v812_v36  ;;  %v421_v24 = vmul.f32 %v808_v32, %v228_v19  ;;  %v443_v26 = vmul.f32 %v808_v32, %v268_v21 }
 0x102   :  { %v426_v27 = vmax.f32 %v422_v16, 0.0  ;;  %v448_v28 = vmax.f32 %v444_v17, 0.0  ;;  %v424_v29 = vadd.f32 %v420_v18, %v810_v33  ;;  %v446_v30 = vadd.f32 %v442_v20, %v810_v33 }
 0x103   :  { %v427_v34 = vmax.f32 %v423_v22, 0.0  ;;  %v449_v35 = vmax.f32 %v445_v23, 0.0  ;;  %v425_v37 = vadd.f32 %v421_v24, %v812_v36  ;;  %v447_v38 = vadd.f32 %v443_v26, %v812_v36  ;;  %403 = vrot.lane.b32.xlu1 %v842_v15, %s693_s0 }
 0x104   :  { %v428_v39 = vmax.f32 %v424_v29, 0.0  ;;  %v450_v40 = vmax.f32 %v446_v30, 0.0  ;;  %v858_v41 = vmax.f32 %v366_v5, %v367_v10 }
 0x105   :  { %v429_v42 = vmax.f32 %v425_v37, 0.0  ;;  %v451_v43 = vmax.f32 %v447_v38, 0.0  ;;  %v232_v44 = vpop.f32.mrb[8].mxu0  ;;  %v272_v45 = vpop.f32.mrb[8].mxu1  ;;  %v860_v46 = vmax.f32 %v426_v27, %v427_v34  ;;  %v862_v47 = vmax.f32 %v448_v28, %v449_v35 }
 0x106   :  { %395 = vrot.lane.b32.xlu0 %v858_v41, %s693_s0  ;;  %v480_v48 = vmul.f32 %v806_v31, %v232_v44  ;;  %v234_v49 = vpop.f32.mrb[9].mxu0  ;;  %v502_v50 = vmul.f32 %v806_v31, %v272_v45  ;;  %v274_v51 = vpop.f32.mrb[9].mxu1 }
 0x107   :  { %v481_v52 = vmul.f32 %v808_v32, %v234_v49  ;;  %v503_v53 = vmul.f32 %v808_v32, %v274_v51  ;;  %v236_v54 = vpop.f32.mrb[10].mxu0  ;;  %v276_v55 = vpop.f32.mrb[10].mxu1  ;;  %v870_v56 = vmax.f32 %v428_v39, %v429_v42  ;;  %v872_v57 = vmax.f32 %v450_v40, %v451_v43 }
 0x108   :  { %v484_v58 = vadd.f32 %v480_v48, %v810_v33  ;;  %v506_v59 = vadd.f32 %v502_v50, %v810_v33  ;;  %v482_v60 = vmul.f32 %v806_v31, %v236_v54  ;;  %v238_v61 = vpop.f32.mrb[11].mxu0  ;;  %v504_v62 = vmul.f32 %v806_v31, %v276_v55  ;;  %v278_v63 = vpop.f32.mrb[11].mxu1 }
 0x109   :  { %v485_v0 = vadd.f32 %v481_v52, %v812_v36  ;;  %v507_v1 = vadd.f32 %v503_v53, %v812_v36  ;;  %v483_v2 = vmul.f32 %v808_v32, %v238_v61  ;;  %v505_v5 = vmul.f32 %v808_v32, %v278_v63  ;;  %456 = vrot.lane.b32.xlu1 %v870_v56, %s693_s0 }
 0x10a   :  { %v488_v6 = vmax.f32 %v484_v58, 0.0  ;;  %v510_v7 = vmax.f32 %v506_v59, 0.0  ;;  %454 = vrot.lane.b32.xlu0 %v860_v46, %s693_s0  ;;  %v486_v8 = vadd.f32 %v482_v60, %v810_v33  ;;  %v508_v9 = vadd.f32 %v504_v62, %v810_v33 }
 0x10b   :  { %v489_v10 = vmax.f32 %v485_v0, 0.0  ;;  %v511_v11 = vmax.f32 %v507_v1, 0.0  ;;  %v487_v12 = vadd.f32 %v483_v2, %v812_v36  ;;  %v509_v13 = vadd.f32 %v505_v5, %v812_v36 }
 0x10c   :  { %v490_v14 = vmax.f32 %v486_v8, 0.0  ;;  %v512_v16 = vmax.f32 %v508_v9, 0.0 }
 0x10d   :  { %v491_v17 = vmax.f32 %v487_v12, 0.0  ;;  %v513_v18 = vmax.f32 %v509_v13, 0.0  ;;  %464 = vrot.lane.b32.xlu1 %v872_v57, %s693_s0  ;;  %v242_v19 = vpop.f32.mrb[12].mxu0  ;;  %v282_v20 = vpop.f32.mrb[12].mxu1  ;;  %v892_v21 = vmax.f32 %v488_v6, %v489_v10  ;;  %v894_v22 = vmax.f32 %v510_v7, %v511_v11 }
 0x10e   :  { %462 = vrot.lane.b32.xlu0 %v862_v47, %s693_s0  ;;  %v542_v23 = vmul.f32 %v806_v31, %v242_v19  ;;  %v244_v24 = vpop.f32.mrb[13].mxu0  ;;  %v564_v26 = vmul.f32 %v806_v31, %v282_v20  ;;  %v284_v27 = vpop.f32.mrb[13].mxu1 }
 0x10f   :  { %v543_v28 = vmul.f32 %v808_v32, %v244_v24  ;;  %v565_v29 = vmul.f32 %v808_v32, %v284_v27  ;;  %v246_v30 = vpop.f32.mrb[14].mxu0  ;;  %v286_v34 = vpop.f32.mrb[14].mxu1  ;;  %v902_v35 = vmax.f32 %v490_v14, %v491_v17  ;;  %v904_v37 = vmax.f32 %v512_v16, %v513_v18 }
 0x110   :  { %v546_v38 = vadd.f32 %v542_v23, %v810_v33  ;;  %v568_v39 = vadd.f32 %v564_v26, %v810_v33  ;;  %v544_v40 = vmul.f32 %v806_v31, %v246_v30  ;;  %v248_v42 = vpop.f32.mrb[15].mxu0  ;;  %v566_v43 = vmul.f32 %v806_v31, %v286_v34  ;;  %v288_v44 = vpop.f32.mrb[15].mxu1 }
 0x111   :  { %v547_v45 = vadd.f32 %v543_v28, %v812_v36  ;;  %v569_v48 = vadd.f32 %v565_v29, %v812_v36  ;;  %v545_v49 = vmul.f32 %v808_v32, %v248_v42  ;;  %v567_v50 = vmul.f32 %v808_v32, %v288_v44  ;;  %518 = vrot.lane.b32.xlu1 %v902_v35, %s693_s0 }
 0x112   :  { %v550_v51 = vmax.f32 %v546_v38, 0.0  ;;  %v572_v52 = vmax.f32 %v568_v39, 0.0  ;;  %516 = vrot.lane.b32.xlu0 %v892_v21, %s693_s0  ;;  %v548_v53 = vadd.f32 %v544_v40, %v810_v33  ;;  %v570_v31 = vadd.f32 %v566_v43, %v810_v33 }
 0x113   :  { %v551_v54 = vmax.f32 %v547_v45, 0.0  ;;  %v573_v55 = vmax.f32 %v569_v48, 0.0  ;;  %v549_v58 = vadd.f32 %v545_v49, %v812_v36  ;;  %v571_v59 = vadd.f32 %v567_v50, %v812_v36 }
 0x114   :  { %v552_v60 = vmax.f32 %v548_v53, 0.0  ;;  %v574_v32 = vmax.f32 %v570_v31, 0.0  ;;  %v326_v36 = vand.u32 127, %v325_v25 }
 0x115   :  { %v553_v61 = vmax.f32 %v549_v58, 0.0  ;;  %v575_v62 = vmax.f32 %v571_v59, 0.0  ;;  %526 = vrot.lane.b32.xlu1 %v904_v37, %s693_s0  ;;  %v576_v63 = vmax.f32 %v550_v51, %v551_v54  ;;  %v584_v0 = vmax.f32 %v572_v52, %v573_v55 }
 0x116   :  { %524 = vrot.lane.b32.xlu0 %v894_v22, %s693_s0  ;;  %vm390_vm0 = vcmp.lt.s32.totalorder %v326_v36, 64 }
 0x117   :  { %v577_v1 = vmax.f32 %v552_v60, %v553_v61  ;;  %v585_v33 = vmax.f32 %v574_v32, %v575_v62 }
 0x119   :  { %580 = vrot.lane.b32.xlu1 %v577_v1, %s693_s0 }
 0x11a   :  { %578 = vrot.lane.b32.xlu0 %v576_v63, %s693_s0 }
 0x11d   :  { %588 = vrot.lane.b32.xlu1 %v585_v33, %s693_s0 }
 0x11e   :  { %586 = vrot.lane.b32.xlu0 %v584_v0, %s693_s0 }
 0x171   :  { %v402_v2 = vpop.permute.xlu1 %401  ;;  %v394_v5 = vpop.permute.xlu0 %393 }
 0x172   :  { %v405_v6 = vmax.f32 %v830_v3, %v402_v2  ;;  %v397_v7 = vmax.f32 %v832_v4, %v394_v5 }
 0x174   :  { %v407_v8 = vsel %vm390_vm0, %v397_v7, %v405_v6 }
 0x175   :  { %409 = vst [vmem:[%s979_s4] sm:$0xff] %v407_v8  ;;  %v404_v9 = vpop.permute.xlu1 %403 }
 0x176   :  { %v406_v10 = vmax.f32 %v842_v15, %v404_v9 }
 0x178   :  { %v396_v11 = vpop.permute.xlu0 %395 }
 0x179   :  { %v398_v12 = vmax.f32 %v858_v41, %v396_v11 }
 0x17b   :  { %v408_v25 = vsel %vm390_vm0, %v398_v12, %v406_v10  ;;  %v457_v13 = vpop.permute.xlu1 %456 }
 0x17c   :  { %410 = vst [vmem:[%s979_s4 + $0x8] sm:$0xff] %v408_v25  ;;  %v455_v3 = vpop.permute.xlu0 %454  ;;  %v459_v14 = vmax.f32 %v870_v56, %v457_v13 }
 0x17d   :  { %v458_v18 = vmax.f32 %v860_v46, %v455_v3 }
 0x17f   :  { %v465_v4 = vpop.permute.xlu1 %464 }
 0x180   :  { %v463_v16 = vpop.permute.xlu0 %462  ;;  %v467_v17 = vmax.f32 %v872_v57, %v465_v4 }
 0x181   :  { %v466_v15 = vmax.f32 %v862_v47, %v463_v16 }
 0x182   :  { %v469_v41 = vsel %vm390_vm0, %v459_v14, %v467_v17 }
 0x183   :  { %v468_v19 = vsel %vm390_vm0, %v458_v18, %v466_v15  ;;  %637 = vst [vmem:[%s979_s4 + $0x18] sm:$0xff] %v469_v41  ;;  %v519_v20 = vpop.permute.xlu1 %518 }
 0x184   :  { %636 = vst [vmem:[%s979_s4 + $0x10] sm:$0xff] %v468_v19  ;;  %v517_v56 = vpop.permute.xlu0 %516  ;;  %v521_v57 = vmax.f32 %v902_v35, %v519_v20 }
 0x185   :  { %v520_v24 = vmax.f32 %v892_v21, %v517_v56 }
 0x187   :  { %v527_v23 = vpop.permute.xlu1 %526 }
 0x188   :  { %v525_v46 = vpop.permute.xlu0 %524  ;;  %v529_v47 = vmax.f32 %v904_v37, %v527_v23 }
 0x189   :  { %v528_v26 = vmax.f32 %v894_v22, %v525_v46 }
 0x18a   :  { %v531_v27 = vsel %vm390_vm0, %v521_v57, %v529_v47 }
 0x18b   :  { %v530_v28 = vsel %vm390_vm0, %v520_v24, %v528_v26  ;;  %639 = vst [vmem:[%s979_s4 + $0x28] sm:$0xff] %v531_v27  ;;  %v581_v29 = vpop.permute.xlu1 %580 }
 0x18c   :  { %638 = vst [vmem:[%s979_s4 + $0x20] sm:$0xff] %v530_v28  ;;  %v579_v30 = vpop.permute.xlu0 %578  ;;  %v583_v35 = vmax.f32 %v577_v1, %v581_v29 }
 0x18d   :  { %v582_v38 = vmax.f32 %v576_v63, %v579_v30 }
 0x18f   :  { %v589_v34 = vpop.permute.xlu1 %588 }
 0x190   :  { %v587_v37 = vpop.permute.xlu0 %586  ;;  %v591_v21 = vmax.f32 %v585_v33, %v589_v34 }
 0x191   :  { %v590_v22 = vmax.f32 %v584_v0, %v587_v37 }
 0x192   :  { %v593_v39 = vsel %vm390_vm0, %v583_v35, %v591_v21 }
 0x193   :  { %v592_v40 = vsel %vm390_vm0, %v582_v38, %v590_v22  ;;  %641 = vst [vmem:[%s979_s4 + $0x38] sm:$0xff] %v593_v39 }
 0x194   :  { %640 = vst [vmem:[%s979_s4 + $0x30] sm:$0xff] %v592_v40 }

</bundles_post_ra>
